<compile_context>
chip_gen: v7x
topology: tpu7x:2x2x1
jax: 0.10.0
libtpu: 0.0.40
codegen_flags: <defaults>
</compile_context>

<pallas_src>
import functools

import jax
import jax.numpy as jnp
from jax.experimental import pallas as pl
from jax.experimental.pallas import tpu as pltpu


# ----------------------------------------------------------------------------
# Fused kernel: one grid step == full forward for one image.
# ----------------------------------------------------------------------------
def _fcn_kernel(x_ref, w0_ref, b0_ref, w1_ref, b1_ref, w2_ref, b2_ref,
                w3_ref, b3_ref, o_ref,
                pad0, rp0, pad1, rp1, pad2, rp2, t0, t1,
                *, H, W, C0, C1, C2):
    H2, W2 = H // 2, W // 2
    H4, W4 = H // 4, W // 4

    def zero_halo(pad_ref, ho, wo):
        # Interior is fully overwritten every image -> zero only the 4 halo
        # strips (cheap), never the full buffer.
        c = pad_ref.shape[-1]
        zrow = jnp.zeros((1, wo + 2, c), jnp.float32)
        pad_ref[0:1, :, :] = zrow
        pad_ref[ho + 1:ho + 2, :, :] = zrow
        zcol = jnp.zeros((ho + 2, 1, c), jnp.float32)
        pad_ref[:, 0:1, :] = zcol
        pad_ref[:, wo + 1:wo + 2, :] = zcol

    def conv3x3_bn_relu(pad_ref, rp_ref, w_ref, b_ref, ho, wo, cin):
        # kw-only im2col ("row patches"): 3 wide copies instead of 9 per-tap
        # copies, narrowed to bf16 at the store (no separate cast pass).  kh is
        # then pure leading-dim addressing, so the 3 MXU matmuls (K = 3*cin)
        # read their operands with no lane/sublane offset.  f32 accumulation.
        for kw in range(3):
            rp_ref[:, :, kw * cin:(kw + 1) * cin] = (
                pad_ref[:, kw:kw + wo, :].astype(jnp.bfloat16))
        acc = jax.lax.dot_general(
            rp_ref[0:ho, :, :], w_ref[0],
            dimension_numbers=(((2,), (0,)), ((), ())),
            preferred_element_type=jnp.float32)
        for kh in (1, 2):
            acc += jax.lax.dot_general(
                rp_ref[kh:kh + ho, :, :], w_ref[kh],
                dimension_numbers=(((2,), (0,)), ((), ())),
                preferred_element_type=jnp.float32)
        return jnp.maximum(acc + b_ref[...].reshape(1, 1, -1), 0.0)

    def maxpool2x2_into(val, t_ref, dst_pad_ref, h2, w2):
        # Row (H) direction: done on the conv-result value via a leading-dim
        # reshape (no store).  Column (W) direction: one buffer + sublane-
        # strided reads, written straight into the next layer's padded
        # interior (no extra intermediate buffer).
        c = val.shape[-1]
        v = val.reshape(h2, 2, 2 * w2, c)
        t_ref[...] = jnp.maximum(v[:, 0, :, :], v[:, 1, :, :])
        dst_pad_ref[1:h2 + 1, 1:w2 + 1, :] = jnp.maximum(
            t_ref[:, pl.ds(0, w2, stride=2), :],
            t_ref[:, pl.ds(1, w2, stride=2), :])

    # ---- backbone stem: conv3x3(3->C0)+BN+ReLU, maxpool2x2 ------------------
    zero_halo(pad0, H, W)
    pad0[1:H + 1, 1:W + 1, :] = x_ref[0]
    a0 = conv3x3_bn_relu(pad0, rp0, w0_ref, b0_ref, H, W, 3)       # (H, W, C0)
    zero_halo(pad1, H2, W2)
    maxpool2x2_into(a0, t0, pad1, H2, W2)                          # -> pad1

    # ---- backbone block: conv3x3(C0->C1)+BN+ReLU, maxpool2x2 ----------------
    a1 = conv3x3_bn_relu(pad1, rp1, w1_ref, b1_ref, H2, W2, C0)    # (H2, W2, C1)
    zero_halo(pad2, H4, W4)
    maxpool2x2_into(a1, t1, pad2, H4, W4)                          # -> pad2

    # ---- FCN head: conv3x3(C1->C2)+BN+ReLU (dropout p=0.1 == identity, eval)
    a2 = conv3x3_bn_relu(pad2, rp2, w2_ref, b2_ref, H4, W4, C1)    # (H4, W4, C2)

    # ---- classifier: 1x1 conv C2 -> 1 class as a lane reduction.  Store as a
    # lane-dense flat (1, 1, H4*W4) row: H4 tiny W4-wide chunk writes (64 B
    # total) instead of a general (H4, W4)->(1, H4*W4) relayout, keeping the
    # output HBM writeback a single dense row.
    logits = jnp.sum(a2 * w3_ref[...].reshape(1, 1, C2), axis=-1) + b3_ref[...]
    for h in range(H4):
        o_ref[0:1, 0:1, h * W4:(h + 1) * W4] = (
            logits[h:h + 1, :].reshape(1, 1, W4).astype(o_ref.dtype))


def fused_fcn_pallas(x_nhwc, w0, b0, w1, b1, w2, b2, w3, b3):
    """x_nhwc: (N, H, W, 3) f32; conv weights BN-folded, per-kh (3, 3*Cin, Cout) bf16."""
    N, H, W, Cin = x_nhwc.shape
    assert Cin == 3 and H % 4 == 0 and W % 4 == 0
    C0, C1, C2 = w0.shape[-1], w1.shape[-1], w2.shape[-1]
    H2, W2, H4, W4 = H // 2, W // 2, H // 4, W // 4

    kernel = functools.partial(_fcn_kernel, H=H, W=W, C0=C0, C1=C1, C2=C2)

    return pl.pallas_call(
        kernel,
        out_shape=jax.ShapeDtypeStruct((N, 1, H4 * W4), jnp.float32),
        grid_spec=pltpu.PrefetchScalarGridSpec(
            num_scalar_prefetch=0,
            grid=(N,),
            in_specs=[
                pl.BlockSpec((1, H, W, Cin), lambda n: (n, 0, 0, 0)),
                pl.BlockSpec(w0.shape, lambda n: (0, 0, 0)),
                pl.BlockSpec(b0.shape, lambda n: (0, 0)),
                pl.BlockSpec(w1.shape, lambda n: (0, 0, 0)),
                pl.BlockSpec(b1.shape, lambda n: (0, 0)),
                pl.BlockSpec(w2.shape, lambda n: (0, 0, 0)),
                pl.BlockSpec(b2.shape, lambda n: (0, 0)),
                pl.BlockSpec(w3.shape, lambda n: (0, 0)),
                pl.BlockSpec(b3.shape, lambda n: (0, 0)),
            ],
            out_specs=pl.BlockSpec((1, 1, H4 * W4), lambda n: (n, 0, 0)),
            scratch_shapes=[
                pltpu.VMEM((H + 2, W + 2, Cin), jnp.float32),      # pad0
                pltpu.VMEM((H + 2, W, 3 * Cin), jnp.bfloat16),     # rp0 (row patches)
                pltpu.VMEM((H2 + 2, W2 + 2, C0), jnp.float32),     # pad1
                pltpu.VMEM((H2 + 2, W2, 3 * C0), jnp.bfloat16),    # rp1
                pltpu.VMEM((H4 + 2, W4 + 2, C1), jnp.float32),     # pad2
                pltpu.VMEM((H4 + 2, W4, 3 * C1), jnp.bfloat16),    # rp2
                pltpu.VMEM((H2, W, C0), jnp.float32),              # t0 (pool row-max)
                pltpu.VMEM((H4, W2, C1), jnp.float32),             # t1 (pool row-max)
            ]),
        compiler_params=pltpu.CompilerParams(
            dimension_semantics=("parallel",)),
    )(x_nhwc, w0, b0, w1, b1, w2, b2, w3, b3)


# ----------------------------------------------------------------------------
# Glue (plain JAX, parameter-sized work only): BN folding, per-kh weight
# layout, bilinear upsample, layout conversion.
# ----------------------------------------------------------------------------
def fold_bn(w, b, gamma, beta, mean, var, eps=1e-5):
    """Fold a following BatchNorm into conv weight/bias (inference semantics)."""
    scale = gamma / jnp.sqrt(var + eps)
    w_f = w * scale[None, None, None, :]
    b_f = (b - mean) * scale + beta
    return w_f, b_f.reshape(1, -1)


def make_params(key, c_stem=16, c_body=32):
    ks = jax.random.split(key, 8)

    def conv_w(k, kh, kw, ci, co):
        return 0.1 * jax.random.normal(k, (kh, kw, ci, co), jnp.float32)

    def bn(k, c):
        return (jnp.ones((c,), jnp.float32),                     # gamma
                jnp.zeros((c,), jnp.float32),                    # beta
                0.01 * jax.random.normal(k, (c,), jnp.float32),  # running mean
                jnp.ones((c,), jnp.float32))                     # running var

    p = {}
    p["w0"] = conv_w(ks[0], 3, 3, 3, c_stem)
    p["b0"] = jnp.zeros((c_stem,), jnp.float32)
    p["bn0"] = bn(ks[1], c_stem)
    p["w1"] = conv_w(ks[2], 3, 3, c_stem, c_body)
    p["b1"] = jnp.zeros((c_body,), jnp.float32)
    p["bn1"] = bn(ks[3], c_body)
    c_mid = c_body // 4
    p["w2"] = conv_w(ks[4], 3, 3, c_body, c_mid)
    p["b2"] = jnp.zeros((c_mid,), jnp.float32)
    p["bn2"] = bn(ks[5], c_mid)
    p["w3"] = conv_w(ks[6], 1, 1, c_mid, 1)          # 1x1 classifier, 1 class
    p["b3"] = jnp.zeros((1,), jnp.float32)
    return p


def model_forward(x_nchw, params):
    """x_nchw: (N, 3, H, W) f32  ->  (N, 1, H, W) f32 segmentation logits."""
    N, _, H, W = x_nchw.shape
    x = jnp.transpose(x_nchw, (0, 2, 3, 1))          # NCHW -> NHWC (tiny; see TODO)

    w0, b0 = fold_bn(params["w0"], params["b0"], *params["bn0"])
    w1, b1 = fold_bn(params["w1"], params["b1"], *params["bn1"])
    w2, b2 = fold_bn(params["w2"], params["b2"], *params["bn2"])

    # Per-kh weight layout (3, 3*Cin, Cout) so kh is leading-dim addressing in
    # the kernel; bf16 MXU operands, f32 accumulation inside the kernel.
    def per_kh(w):
        kh, kw, ci, co = w.shape
        return w.reshape(kh, kw * ci, co).astype(jnp.bfloat16)

    w0i, w1i, w2i = per_kh(w0), per_kh(w1), per_kh(w2)
    w3v = params["w3"].reshape(1, -1)                # (1, C2) classifier vec (f32)
    b3v = params["b3"].reshape(1, 1)

    logits_q = fused_fcn_pallas(x, w0i, b0, w1i, b1, w2i, b2, w3v, b3v)
    H4, W4 = H // 4, W // 4
    logits_q = logits_q.reshape(N, 1, H4, W4)

    # Bilinear upsample to the input resolution, as in torchvision FCN.
    # TODO(synk): verify jax.image.resize half-pixel edge behavior matches
    # torch F.interpolate(align_corners=False) exactly.
    logits = jax.image.resize(logits_q, (N, 1, H, W), method="bilinear")
    return logits


if __name__ == "__main__":
    key = jax.random.PRNGKey(0)
    k_x, k_p = jax.random.split(key)

    N, C, H, W = 2, 3, 16, 16                 # small RGB images
    x = jax.random.normal(k_x, (N, C, H, W), jnp.float32)
    params = make_params(k_p)

    fwd = jax.jit(model_forward)
    y = jax.block_until_ready(fwd(x, params))

    assert y.shape == (N, 1, H, W), y.shape
    assert bool(jnp.all(jnp.isfinite(y)))
    print("KERNEL_OK")
</pallas_src>

<mosaic_0001>
module attributes {stable_mosaic.version = 11 : i64} {
  func.func @_fcn_kernel(%arg0: i32, %arg1: memref<1x16x16x3xf32, #tpu.memory_space<vmem>>, %arg2: memref<3x9x16xbf16, #tpu.memory_space<vmem>>, %arg3: memref<1x16xf32, #tpu.memory_space<vmem>>, %arg4: memref<3x48x32xbf16, #tpu.memory_space<vmem>>, %arg5: memref<1x32xf32, #tpu.memory_space<vmem>>, %arg6: memref<3x96x8xbf16, #tpu.memory_space<vmem>>, %arg7: memref<1x8xf32, #tpu.memory_space<vmem>>, %arg8: memref<1x8xf32, #tpu.memory_space<vmem>>, %arg9: memref<1x1xf32, #tpu.memory_space<vmem>>, %arg10: memref<1x1x16xf32, #tpu.memory_space<vmem>>, %arg11: memref<18x18x3xf32, #tpu.memory_space<vmem>>, %arg12: memref<18x16x9xbf16, #tpu.memory_space<vmem>>, %arg13: memref<10x10x16xf32, #tpu.memory_space<vmem>>, %arg14: memref<10x8x48xbf16, #tpu.memory_space<vmem>>, %arg15: memref<6x6x32xf32, #tpu.memory_space<vmem>>, %arg16: memref<6x4x96xbf16, #tpu.memory_space<vmem>>, %arg17: memref<8x16x16xf32, #tpu.memory_space<vmem>>, %arg18: memref<4x8x32xf32, #tpu.memory_space<vmem>>) attributes {dimension_semantics = [#tpu.dimension_semantics<parallel>], iteration_bounds = array<i64: 2>, scalar_prefetch = 0 : i64, scratch_operands = 8 : i64, tpu.core_type = #tpu.core_type<tc>, window_params = [{transform_indices = @transform_0, window_bounds = array<i64: 1, 16, 16, 3>}, {pipeline_mode = #tpu.pipeline_mode<synchronous>, transform_indices = @transform_1, window_bounds = array<i64: 3, 9, 16>}, {pipeline_mode = #tpu.pipeline_mode<synchronous>, transform_indices = @transform_2, window_bounds = array<i64: 1, 16>}, {pipeline_mode = #tpu.pipeline_mode<synchronous>, transform_indices = @transform_3, window_bounds = array<i64: 3, 48, 32>}, {pipeline_mode = #tpu.pipeline_mode<synchronous>, transform_indices = @transform_4, window_bounds = array<i64: 1, 32>}, {pipeline_mode = #tpu.pipeline_mode<synchronous>, transform_indices = @transform_5, window_bounds = array<i64: 3, 96, 8>}, {pipeline_mode = #tpu.pipeline_mode<synchronous>, transform_indices = @transform_6, window_bounds = array<i64: 1, 8>}, {pipeline_mode = #tpu.pipeline_mode<synchronous>, transform_indices = @transform_7, window_bounds = array<i64: 1, 8>}, {pipeline_mode = #tpu.pipeline_mode<synchronous>, transform_indices = @transform_8, window_bounds = array<i64: 1, 1>}, {transform_indices = @transform_9, window_bounds = array<i64: 1, 1, 16>}]} {
    %cst = arith.constant 0.000000e+00 : f32
    %0 = vector.broadcast %cst : f32 to vector<1x18x3xf32>
    %c0 = arith.constant 0 : index
    %c0_0 = arith.constant 0 : index
    %c0_1 = arith.constant 0 : index
    %1 = vector.load %arg11[%c0, %c0_0, %c0_1] : memref<18x18x3xf32, #tpu.memory_space<vmem>>, vector<1x18x3xf32>
    tpu.vector_store %arg11[%c0, %c0_0, %c0_1], %0 {strides = array<i32>} : memref<18x18x3xf32, #tpu.memory_space<vmem>>, vector<1x18x3xf32>,
    %c17 = arith.constant 17 : index
    %c0_2 = arith.constant 0 : index
    %c0_3 = arith.constant 0 : index
    %2 = vector.load %arg11[%c17, %c0_2, %c0_3] : memref<18x18x3xf32, #tpu.memory_space<vmem>>, vector<1x18x3xf32>
    tpu.vector_store %arg11[%c17, %c0_2, %c0_3], %0 {strides = array<i32>} : memref<18x18x3xf32, #tpu.memory_space<vmem>>, vector<1x18x3xf32>,
    %cst_4 = arith.constant 0.000000e+00 : f32
    %3 = vector.broadcast %cst_4 : f32 to vector<18x1x3xf32>
    %c0_5 = arith.constant 0 : index
    %c0_6 = arith.constant 0 : index
    %c0_7 = arith.constant 0 : index
    %4 = vector.load %arg11[%c0_5, %c0_6, %c0_7] : memref<18x18x3xf32, #tpu.memory_space<vmem>>, vector<18x1x3xf32>
    tpu.vector_store %arg11[%c0_5, %c0_6, %c0_7], %3 {strides = array<i32>} : memref<18x18x3xf32, #tpu.memory_space<vmem>>, vector<18x1x3xf32>,
    %c0_8 = arith.constant 0 : index
    %c17_9 = arith.constant 17 : index
    %c0_10 = arith.constant 0 : index
    %5 = vector.load %arg11[%c0_8, %c17_9, %c0_10] : memref<18x18x3xf32, #tpu.memory_space<vmem>>, vector<18x1x3xf32>
    tpu.vector_store %arg11[%c0_8, %c17_9, %c0_10], %3 {strides = array<i32>} : memref<18x18x3xf32, #tpu.memory_space<vmem>>, vector<18x1x3xf32>,
    %c0_11 = arith.constant 0 : index
    %c0_12 = arith.constant 0 : index
    %c0_13 = arith.constant 0 : index
    %c0_14 = arith.constant 0 : index
    %6 = vector.load %arg1[%c0_11, %c0_12, %c0_13, %c0_14] : memref<1x16x16x3xf32, #tpu.memory_space<vmem>>, vector<1x16x16x3xf32>
    %7 = vector.shape_cast %6 : vector<1x16x16x3xf32> to vector<16x16x3xf32>
    %c1 = arith.constant 1 : index
    %c1_15 = arith.constant 1 : index
    %c0_16 = arith.constant 0 : index
    %8 = vector.load %arg11[%c1, %c1_15, %c0_16] : memref<18x18x3xf32, #tpu.memory_space<vmem>>, vector<16x16x3xf32>
    tpu.vector_store %arg11[%c1, %c1_15, %c0_16], %7 {strides = array<i32>} : memref<18x18x3xf32, #tpu.memory_space<vmem>>, vector<16x16x3xf32>,
    %c0_17 = arith.constant 0 : index
    %c0_18 = arith.constant 0 : index
    %c0_19 = arith.constant 0 : index
    %9 = vector.load %arg11[%c0_17, %c0_18, %c0_19] : memref<18x18x3xf32, #tpu.memory_space<vmem>>, vector<18x16x3xf32>
    %10 = arith.truncf %9 : vector<18x16x3xf32> to vector<18x16x3xbf16>
    %c0_20 = arith.constant 0 : index
    %c0_21 = arith.constant 0 : index
    %c0_22 = arith.constant 0 : index
    %11 = vector.load %arg12[%c0_20, %c0_21, %c0_22] : memref<18x16x9xbf16, #tpu.memory_space<vmem>>, vector<18x16x3xbf16>
    tpu.vector_store %arg12[%c0_20, %c0_21, %c0_22], %10 {strides = array<i32>} : memref<18x16x9xbf16, #tpu.memory_space<vmem>>, vector<18x16x3xbf16>,
    %c0_23 = arith.constant 0 : index
    %c1_24 = arith.constant 1 : index
    %c0_25 = arith.constant 0 : index
    %12 = vector.load %arg11[%c0_23, %c1_24, %c0_25] : memref<18x18x3xf32, #tpu.memory_space<vmem>>, vector<18x16x3xf32>
    %13 = arith.truncf %12 : vector<18x16x3xf32> to vector<18x16x3xbf16>
    %c0_26 = arith.constant 0 : index
    %c0_27 = arith.constant 0 : index
    %c3 = arith.constant 3 : index
    %14 = vector.load %arg12[%c0_26, %c0_27, %c3] : memref<18x16x9xbf16, #tpu.memory_space<vmem>>, vector<18x16x3xbf16>
    tpu.vector_store %arg12[%c0_26, %c0_27, %c3], %13 {strides = array<i32>} : memref<18x16x9xbf16, #tpu.memory_space<vmem>>, vector<18x16x3xbf16>,
    %c0_28 = arith.constant 0 : index
    %c2 = arith.constant 2 : index
    %c0_29 = arith.constant 0 : index
    %15 = vector.load %arg11[%c0_28, %c2, %c0_29] : memref<18x18x3xf32, #tpu.memory_space<vmem>>, vector<18x16x3xf32>
    %16 = arith.truncf %15 : vector<18x16x3xf32> to vector<18x16x3xbf16>
    %c0_30 = arith.constant 0 : index
    %c0_31 = arith.constant 0 : index
    %c6 = arith.constant 6 : index
    %17 = vector.load %arg12[%c0_30, %c0_31, %c6] : memref<18x16x9xbf16, #tpu.memory_space<vmem>>, vector<18x16x3xbf16>
    tpu.vector_store %arg12[%c0_30, %c0_31, %c6], %16 {strides = array<i32>} : memref<18x16x9xbf16, #tpu.memory_space<vmem>>, vector<18x16x3xbf16>,
    %c0_32 = arith.constant 0 : index
    %c0_33 = arith.constant 0 : index
    %c0_34 = arith.constant 0 : index
    %18 = vector.load %arg12[%c0_32, %c0_33, %c0_34] : memref<18x16x9xbf16, #tpu.memory_space<vmem>>, vector<16x16x9xbf16>
    %c0_35 = arith.constant 0 : index
    %c0_36 = arith.constant 0 : index
    %c0_37 = arith.constant 0 : index
    %19 = vector.load %arg2[%c0_35, %c0_36, %c0_37] : memref<3x9x16xbf16, #tpu.memory_space<vmem>>, vector<1x9x16xbf16>
    %20 = vector.shape_cast %19 : vector<1x9x16xbf16> to vector<9x16xbf16>
    %cst_38 = arith.constant dense<0.000000e+00> : vector<16x16x16xf32>
    %21 = tpu.matmul %18, %20, %cst_38 {dimension_numbers = #tpu.dot_dimension_numbers<[2], [0], [0, 1], [1], [0, 0, 0, 1, 1, 1], [], []>} : vector<16x16x9xbf16>, vector<9x16xbf16>, vector<16x16x16xf32> -> vector<16x16x16xf32>
    %c1_39 = arith.constant 1 : index
    %c0_40 = arith.constant 0 : index
    %c0_41 = arith.constant 0 : index
    %22 = vector.load %arg12[%c1_39, %c0_40, %c0_41] : memref<18x16x9xbf16, #tpu.memory_space<vmem>>, vector<16x16x9xbf16>
    %c1_42 = arith.constant 1 : index
    %c0_43 = arith.constant 0 : index
    %c0_44 = arith.constant 0 : index
    %23 = vector.load %arg2[%c1_42, %c0_43, %c0_44] : memref<3x9x16xbf16, #tpu.memory_space<vmem>>, vector<1x9x16xbf16>
    %24 = vector.shape_cast %23 : vector<1x9x16xbf16> to vector<9x16xbf16>
    %cst_45 = arith.constant dense<0.000000e+00> : vector<16x16x16xf32>
    %25 = tpu.matmul %22, %24, %cst_45 {dimension_numbers = #tpu.dot_dimension_numbers<[2], [0], [0, 1], [1], [0, 0, 0, 1, 1, 1], [], []>} : vector<16x16x9xbf16>, vector<9x16xbf16>, vector<16x16x16xf32> -> vector<16x16x16xf32>
    %26 = arith.addf %21, %25 : vector<16x16x16xf32>
    %c2_46 = arith.constant 2 : index
    %c0_47 = arith.constant 0 : index
    %c0_48 = arith.constant 0 : index
    %27 = vector.load %arg12[%c2_46, %c0_47, %c0_48] : memref<18x16x9xbf16, #tpu.memory_space<vmem>>, vector<16x16x9xbf16>
    %c2_49 = arith.constant 2 : index
    %c0_50 = arith.constant 0 : index
    %c0_51 = arith.constant 0 : index
    %28 = vector.load %arg2[%c2_49, %c0_50, %c0_51] : memref<3x9x16xbf16, #tpu.memory_space<vmem>>, vector<1x9x16xbf16>
    %29 = vector.shape_cast %28 : vector<1x9x16xbf16> to vector<9x16xbf16>
    %cst_52 = arith.constant dense<0.000000e+00> : vector<16x16x16xf32>
    %30 = tpu.matmul %27, %29, %cst_52 {dimension_numbers = #tpu.dot_dimension_numbers<[2], [0], [0, 1], [1], [0, 0, 0, 1, 1, 1], [], []>} : vector<16x16x9xbf16>, vector<9x16xbf16>, vector<16x16x16xf32> -> vector<16x16x16xf32>
    %31 = arith.addf %26, %30 : vector<16x16x16xf32>
    %c0_53 = arith.constant 0 : index
    %c0_54 = arith.constant 0 : index
    %32 = vector.load %arg3[%c0_53, %c0_54] : memref<1x16xf32, #tpu.memory_space<vmem>>, vector<1x16xf32>
    %33 = vector.shape_cast %32 : vector<1x16xf32> to vector<1x1x16xf32>
    %34 = vector.broadcast %33 : vector<1x1x16xf32> to vector<16x16x16xf32>
    %35 = arith.addf %31, %34 : vector<16x16x16xf32>
    %cst_55 = arith.constant 0.000000e+00 : f32
    %36 = vector.broadcast %cst_55 : f32 to vector<16x16x16xf32>
    %37 = arith.maximumf %35, %36 : vector<16x16x16xf32>
    %cst_56 = arith.constant 0.000000e+00 : f32
    %38 = vector.broadcast %cst_56 : f32 to vector<1x10x16xf32>
    %c0_57 = arith.constant 0 : index
    %c0_58 = arith.constant 0 : index
    %c0_59 = arith.constant 0 : index
    %39 = vector.load %arg13[%c0_57, %c0_58, %c0_59] : memref<10x10x16xf32, #tpu.memory_space<vmem>>, vector<1x10x16xf32>
    tpu.vector_store %arg13[%c0_57, %c0_58, %c0_59], %38 {strides = array<i32>} : memref<10x10x16xf32, #tpu.memory_space<vmem>>, vector<1x10x16xf32>,
    %c9 = arith.constant 9 : index
    %c0_60 = arith.constant 0 : index
    %c0_61 = arith.constant 0 : index
    %40 = vector.load %arg13[%c9, %c0_60, %c0_61] : memref<10x10x16xf32, #tpu.memory_space<vmem>>, vector<1x10x16xf32>
    tpu.vector_store %arg13[%c9, %c0_60, %c0_61], %38 {strides = array<i32>} : memref<10x10x16xf32, #tpu.memory_space<vmem>>, vector<1x10x16xf32>,
    %cst_62 = arith.constant 0.000000e+00 : f32
    %41 = vector.broadcast %cst_62 : f32 to vector<10x1x16xf32>
    %c0_63 = arith.constant 0 : index
    %c0_64 = arith.constant 0 : index
    %c0_65 = arith.constant 0 : index
    %42 = vector.load %arg13[%c0_63, %c0_64, %c0_65] : memref<10x10x16xf32, #tpu.memory_space<vmem>>, vector<10x1x16xf32>
    tpu.vector_store %arg13[%c0_63, %c0_64, %c0_65], %41 {strides = array<i32>} : memref<10x10x16xf32, #tpu.memory_space<vmem>>, vector<10x1x16xf32>,
    %c0_66 = arith.constant 0 : index
    %c9_67 = arith.constant 9 : index
    %c0_68 = arith.constant 0 : index
    %43 = vector.load %arg13[%c0_66, %c9_67, %c0_68] : memref<10x10x16xf32, #tpu.memory_space<vmem>>, vector<10x1x16xf32>
    tpu.vector_store %arg13[%c0_66, %c9_67, %c0_68], %41 {strides = array<i32>} : memref<10x10x16xf32, #tpu.memory_space<vmem>>, vector<10x1x16xf32>,
    %44 = vector.shape_cast %37 : vector<16x16x16xf32> to vector<8x2x16x16xf32>
    %45 = vector.extract_strided_slice %44 {offsets = [0, 0, 0, 0], sizes = [8, 1, 16, 16], strides = [1, 1, 1, 1]} : vector<8x2x16x16xf32> to vector<8x1x16x16xf32>
    %46 = vector.shape_cast %45 : vector<8x1x16x16xf32> to vector<8x16x16xf32>
    %47 = vector.extract_strided_slice %44 {offsets = [0, 1, 0, 0], sizes = [8, 1, 16, 16], strides = [1, 1, 1, 1]} : vector<8x2x16x16xf32> to vector<8x1x16x16xf32>
    %48 = vector.shape_cast %47 : vector<8x1x16x16xf32> to vector<8x16x16xf32>
    %49 = arith.maximumf %46, %48 : vector<8x16x16xf32>
    %c0_69 = arith.constant 0 : index
    %c0_70 = arith.constant 0 : index
    %c0_71 = arith.constant 0 : index
    %50 = vector.load %arg17[%c0_69, %c0_70, %c0_71] : memref<8x16x16xf32, #tpu.memory_space<vmem>>, vector<8x16x16xf32>
    tpu.vector_store %arg17[%c0_69, %c0_70, %c0_71], %49 {strides = array<i32>} : memref<8x16x16xf32, #tpu.memory_space<vmem>>, vector<8x16x16xf32>,
    %c0_72 = arith.constant 0 : index
    %c0_73 = arith.constant 0 : index
    %c0_74 = arith.constant 0 : index
    %51 = tpu.strided_load %arg17[%c0_72, %c0_73, %c0_74] {strides = array<i32: 1, 2, 1>} : memref<8x16x16xf32, #tpu.memory_space<vmem>>, vector<8x8x16xf32>
    %c0_75 = arith.constant 0 : index
    %c1_76 = arith.constant 1 : index
    %c0_77 = arith.constant 0 : index
    %52 = tpu.strided_load %arg17[%c0_75, %c1_76, %c0_77] {strides = array<i32: 1, 2, 1>} : memref<8x16x16xf32, #tpu.memory_space<vmem>>, vector<8x8x16xf32>
    %53 = arith.maximumf %51, %52 : vector<8x8x16xf32>
    %c1_78 = arith.constant 1 : index
    %c1_79 = arith.constant 1 : index
    %c0_80 = arith.constant 0 : index
    %54 = vector.load %arg13[%c1_78, %c1_79, %c0_80] : memref<10x10x16xf32, #tpu.memory_space<vmem>>, vector<8x8x16xf32>
    tpu.vector_store %arg13[%c1_78, %c1_79, %c0_80], %53 {strides = array<i32>} : memref<10x10x16xf32, #tpu.memory_space<vmem>>, vector<8x8x16xf32>,
    %c0_81 = arith.constant 0 : index
    %c0_82 = arith.constant 0 : index
    %c0_83 = arith.constant 0 : index
    %55 = vector.load %arg13[%c0_81, %c0_82, %c0_83] : memref<10x10x16xf32, #tpu.memory_space<vmem>>, vector<10x8x16xf32>
    %56 = arith.truncf %55 : vector<10x8x16xf32> to vector<10x8x16xbf16>
    %c0_84 = arith.constant 0 : index
    %c0_85 = arith.constant 0 : index
    %c0_86 = arith.constant 0 : index
    %57 = vector.load %arg14[%c0_84, %c0_85, %c0_86] : memref<10x8x48xbf16, #tpu.memory_space<vmem>>, vector<10x8x16xbf16>
    tpu.vector_store %arg14[%c0_84, %c0_85, %c0_86], %56 {strides = array<i32>} : memref<10x8x48xbf16, #tpu.memory_space<vmem>>, vector<10x8x16xbf16>,
    %c0_87 = arith.constant 0 : index
    %c1_88 = arith.constant 1 : index
    %c0_89 = arith.constant 0 : index
    %58 = vector.load %arg13[%c0_87, %c1_88, %c0_89] : memref<10x10x16xf32, #tpu.memory_space<vmem>>, vector<10x8x16xf32>
    %59 = arith.truncf %58 : vector<10x8x16xf32> to vector<10x8x16xbf16>
    %c0_90 = arith.constant 0 : index
    %c0_91 = arith.constant 0 : index
    %c16 = arith.constant 16 : index
    %60 = vector.load %arg14[%c0_90, %c0_91, %c16] : memref<10x8x48xbf16, #tpu.memory_space<vmem>>, vector<10x8x16xbf16>
    tpu.vector_store %arg14[%c0_90, %c0_91, %c16], %59 {strides = array<i32>} : memref<10x8x48xbf16, #tpu.memory_space<vmem>>, vector<10x8x16xbf16>,
    %c0_92 = arith.constant 0 : index
    %c2_93 = arith.constant 2 : index
    %c0_94 = arith.constant 0 : index
    %61 = vector.load %arg13[%c0_92, %c2_93, %c0_94] : memref<10x10x16xf32, #tpu.memory_space<vmem>>, vector<10x8x16xf32>
    %62 = arith.truncf %61 : vector<10x8x16xf32> to vector<10x8x16xbf16>
    %c0_95 = arith.constant 0 : index
    %c0_96 = arith.constant 0 : index
    %c32 = arith.constant 32 : index
    %63 = vector.load %arg14[%c0_95, %c0_96, %c32] : memref<10x8x48xbf16, #tpu.memory_space<vmem>>, vector<10x8x16xbf16>
    tpu.vector_store %arg14[%c0_95, %c0_96, %c32], %62 {strides = array<i32>} : memref<10x8x48xbf16, #tpu.memory_space<vmem>>, vector<10x8x16xbf16>,
    %c0_97 = arith.constant 0 : index
    %c0_98 = arith.constant 0 : index
    %c0_99 = arith.constant 0 : index
    %64 = vector.load %arg14[%c0_97, %c0_98, %c0_99] : memref<10x8x48xbf16, #tpu.memory_space<vmem>>, vector<8x8x48xbf16>
    %c0_100 = arith.constant 0 : index
    %c0_101 = arith.constant 0 : index
    %c0_102 = arith.constant 0 : index
    %65 = vector.load %arg4[%c0_100, %c0_101, %c0_102] : memref<3x48x32xbf16, #tpu.memory_space<vmem>>, vector<1x48x32xbf16>
    %66 = vector.shape_cast %65 : vector<1x48x32xbf16> to vector<48x32xbf16>
    %cst_103 = arith.constant dense<0.000000e+00> : vector<8x8x32xf32>
    %67 = tpu.matmul %64, %66, %cst_103 {dimension_numbers = #tpu.dot_dimension_numbers<[2], [0], [0, 1], [1], [0, 0, 0, 1, 1, 1], [], []>} : vector<8x8x48xbf16>, vector<48x32xbf16>, vector<8x8x32xf32> -> vector<8x8x32xf32>
    %c1_104 = arith.constant 1 : index
    %c0_105 = arith.constant 0 : index
    %c0_106 = arith.constant 0 : index
    %68 = vector.load %arg14[%c1_104, %c0_105, %c0_106] : memref<10x8x48xbf16, #tpu.memory_space<vmem>>, vector<8x8x48xbf16>
    %c1_107 = arith.constant 1 : index
    %c0_108 = arith.constant 0 : index
    %c0_109 = arith.constant 0 : index
    %69 = vector.load %arg4[%c1_107, %c0_108, %c0_109] : memref<3x48x32xbf16, #tpu.memory_space<vmem>>, vector<1x48x32xbf16>
    %70 = vector.shape_cast %69 : vector<1x48x32xbf16> to vector<48x32xbf16>
    %cst_110 = arith.constant dense<0.000000e+00> : vector<8x8x32xf32>
    %71 = tpu.matmul %68, %70, %cst_110 {dimension_numbers = #tpu.dot_dimension_numbers<[2], [0], [0, 1], [1], [0, 0, 0, 1, 1, 1], [], []>} : vector<8x8x48xbf16>, vector<48x32xbf16>, vector<8x8x32xf32> -> vector<8x8x32xf32>
    %72 = arith.addf %67, %71 : vector<8x8x32xf32>
    %c2_111 = arith.constant 2 : index
    %c0_112 = arith.constant 0 : index
    %c0_113 = arith.constant 0 : index
    %73 = vector.load %arg14[%c2_111, %c0_112, %c0_113] : memref<10x8x48xbf16, #tpu.memory_space<vmem>>, vector<8x8x48xbf16>
    %c2_114 = arith.constant 2 : index
    %c0_115 = arith.constant 0 : index
    %c0_116 = arith.constant 0 : index
    %74 = vector.load %arg4[%c2_114, %c0_115, %c0_116] : memref<3x48x32xbf16, #tpu.memory_space<vmem>>, vector<1x48x32xbf16>
    %75 = vector.shape_cast %74 : vector<1x48x32xbf16> to vector<48x32xbf16>
    %cst_117 = arith.constant dense<0.000000e+00> : vector<8x8x32xf32>
    %76 = tpu.matmul %73, %75, %cst_117 {dimension_numbers = #tpu.dot_dimension_numbers<[2], [0], [0, 1], [1], [0, 0, 0, 1, 1, 1], [], []>} : vector<8x8x48xbf16>, vector<48x32xbf16>, vector<8x8x32xf32> -> vector<8x8x32xf32>
    %77 = arith.addf %72, %76 : vector<8x8x32xf32>
    %c0_118 = arith.constant 0 : index
    %c0_119 = arith.constant 0 : index
    %78 = vector.load %arg5[%c0_118, %c0_119] : memref<1x32xf32, #tpu.memory_space<vmem>>, vector<1x32xf32>
    %79 = vector.shape_cast %78 : vector<1x32xf32> to vector<1x1x32xf32>
    %80 = vector.broadcast %79 : vector<1x1x32xf32> to vector<8x8x32xf32>
    %81 = arith.addf %77, %80 : vector<8x8x32xf32>
    %cst_120 = arith.constant 0.000000e+00 : f32
    %82 = vector.broadcast %cst_120 : f32 to vector<8x8x32xf32>
    %83 = arith.maximumf %81, %82 : vector<8x8x32xf32>
    %cst_121 = arith.constant 0.000000e+00 : f32
    %84 = vector.broadcast %cst_121 : f32 to vector<1x6x32xf32>
    %c0_122 = arith.constant 0 : index
    %c0_123 = arith.constant 0 : index
    %c0_124 = arith.constant 0 : index
    %85 = vector.load %arg15[%c0_122, %c0_123, %c0_124] : memref<6x6x32xf32, #tpu.memory_space<vmem>>, vector<1x6x32xf32>
    tpu.vector_store %arg15[%c0_122, %c0_123, %c0_124], %84 {strides = array<i32>} : memref<6x6x32xf32, #tpu.memory_space<vmem>>, vector<1x6x32xf32>,
    %c5 = arith.constant 5 : index
    %c0_125 = arith.constant 0 : index
    %c0_126 = arith.constant 0 : index
    %86 = vector.load %arg15[%c5, %c0_125, %c0_126] : memref<6x6x32xf32, #tpu.memory_space<vmem>>, vector<1x6x32xf32>
    tpu.vector_store %arg15[%c5, %c0_125, %c0_126], %84 {strides = array<i32>} : memref<6x6x32xf32, #tpu.memory_space<vmem>>, vector<1x6x32xf32>,
    %cst_127 = arith.constant 0.000000e+00 : f32
    %87 = vector.broadcast %cst_127 : f32 to vector<6x1x32xf32>
    %c0_128 = arith.constant 0 : index
    %c0_129 = arith.constant 0 : index
    %c0_130 = arith.constant 0 : index
    %88 = vector.load %arg15[%c0_128, %c0_129, %c0_130] : memref<6x6x32xf32, #tpu.memory_space<vmem>>, vector<6x1x32xf32>
    tpu.vector_store %arg15[%c0_128, %c0_129, %c0_130], %87 {strides = array<i32>} : memref<6x6x32xf32, #tpu.memory_space<vmem>>, vector<6x1x32xf32>,
    %c0_131 = arith.constant 0 : index
    %c5_132 = arith.constant 5 : index
    %c0_133 = arith.constant 0 : index
    %89 = vector.load %arg15[%c0_131, %c5_132, %c0_133] : memref<6x6x32xf32, #tpu.memory_space<vmem>>, vector<6x1x32xf32>
    tpu.vector_store %arg15[%c0_131, %c5_132, %c0_133], %87 {strides = array<i32>} : memref<6x6x32xf32, #tpu.memory_space<vmem>>, vector<6x1x32xf32>,
    %90 = vector.shape_cast %83 : vector<8x8x32xf32> to vector<4x2x8x32xf32>
    %91 = vector.extract_strided_slice %90 {offsets = [0, 0, 0, 0], sizes = [4, 1, 8, 32], strides = [1, 1, 1, 1]} : vector<4x2x8x32xf32> to vector<4x1x8x32xf32>
    %92 = vector.shape_cast %91 : vector<4x1x8x32xf32> to vector<4x8x32xf32>
    %93 = vector.extract_strided_slice %90 {offsets = [0, 1, 0, 0], sizes = [4, 1, 8, 32], strides = [1, 1, 1, 1]} : vector<4x2x8x32xf32> to vector<4x1x8x32xf32>
    %94 = vector.shape_cast %93 : vector<4x1x8x32xf32> to vector<4x8x32xf32>
    %95 = arith.maximumf %92, %94 : vector<4x8x32xf32>
    %c0_134 = arith.constant 0 : index
    %c0_135 = arith.constant 0 : index
    %c0_136 = arith.constant 0 : index
    %96 = vector.load %arg18[%c0_134, %c0_135, %c0_136] : memref<4x8x32xf32, #tpu.memory_space<vmem>>, vector<4x8x32xf32>
    tpu.vector_store %arg18[%c0_134, %c0_135, %c0_136], %95 {strides = array<i32>} : memref<4x8x32xf32, #tpu.memory_space<vmem>>, vector<4x8x32xf32>,
    %c0_137 = arith.constant 0 : index
    %c0_138 = arith.constant 0 : index
    %c0_139 = arith.constant 0 : index
    %97 = tpu.strided_load %arg18[%c0_137, %c0_138, %c0_139] {strides = array<i32: 1, 2, 1>} : memref<4x8x32xf32, #tpu.memory_space<vmem>>, vector<4x4x32xf32>
    %c0_140 = arith.constant 0 : index
    %c1_141 = arith.constant 1 : index
    %c0_142 = arith.constant 0 : index
    %98 = tpu.strided_load %arg18[%c0_140, %c1_141, %c0_142] {strides = array<i32: 1, 2, 1>} : memref<4x8x32xf32, #tpu.memory_space<vmem>>, vector<4x4x32xf32>
    %99 = arith.maximumf %97, %98 : vector<4x4x32xf32>
    %c1_143 = arith.constant 1 : index
    %c1_144 = arith.constant 1 : index
    %c0_145 = arith.constant 0 : index
    %100 = vector.load %arg15[%c1_143, %c1_144, %c0_145] : memref<6x6x32xf32, #tpu.memory_space<vmem>>, vector<4x4x32xf32>
    tpu.vector_store %arg15[%c1_143, %c1_144, %c0_145], %99 {strides = array<i32>} : memref<6x6x32xf32, #tpu.memory_space<vmem>>, vector<4x4x32xf32>,
    %c0_146 = arith.constant 0 : index
    %c0_147 = arith.constant 0 : index
    %c0_148 = arith.constant 0 : index
    %101 = vector.load %arg15[%c0_146, %c0_147, %c0_148] : memref<6x6x32xf32, #tpu.memory_space<vmem>>, vector<6x4x32xf32>
    %102 = arith.truncf %101 : vector<6x4x32xf32> to vector<6x4x32xbf16>
    %c0_149 = arith.constant 0 : index
    %c0_150 = arith.constant 0 : index
    %c0_151 = arith.constant 0 : index
    %103 = vector.load %arg16[%c0_149, %c0_150, %c0_151] : memref<6x4x96xbf16, #tpu.memory_space<vmem>>, vector<6x4x32xbf16>
    tpu.vector_store %arg16[%c0_149, %c0_150, %c0_151], %102 {strides = array<i32>} : memref<6x4x96xbf16, #tpu.memory_space<vmem>>, vector<6x4x32xbf16>,
    %c0_152 = arith.constant 0 : index
    %c1_153 = arith.constant 1 : index
    %c0_154 = arith.constant 0 : index
    %104 = vector.load %arg15[%c0_152, %c1_153, %c0_154] : memref<6x6x32xf32, #tpu.memory_space<vmem>>, vector<6x4x32xf32>
    %105 = arith.truncf %104 : vector<6x4x32xf32> to vector<6x4x32xbf16>
    %c0_155 = arith.constant 0 : index
    %c0_156 = arith.constant 0 : index
    %c32_157 = arith.constant 32 : index
    %106 = vector.load %arg16[%c0_155, %c0_156, %c32_157] : memref<6x4x96xbf16, #tpu.memory_space<vmem>>, vector<6x4x32xbf16>
    tpu.vector_store %arg16[%c0_155, %c0_156, %c32_157], %105 {strides = array<i32>} : memref<6x4x96xbf16, #tpu.memory_space<vmem>>, vector<6x4x32xbf16>,
    %c0_158 = arith.constant 0 : index
    %c2_159 = arith.constant 2 : index
    %c0_160 = arith.constant 0 : index
    %107 = vector.load %arg15[%c0_158, %c2_159, %c0_160] : memref<6x6x32xf32, #tpu.memory_space<vmem>>, vector<6x4x32xf32>
    %108 = arith.truncf %107 : vector<6x4x32xf32> to vector<6x4x32xbf16>
    %c0_161 = arith.constant 0 : index
    %c0_162 = arith.constant 0 : index
    %c64 = arith.constant 64 : index
    %109 = vector.load %arg16[%c0_161, %c0_162, %c64] : memref<6x4x96xbf16, #tpu.memory_space<vmem>>, vector<6x4x32xbf16>
    tpu.vector_store %arg16[%c0_161, %c0_162, %c64], %108 {strides = array<i32>} : memref<6x4x96xbf16, #tpu.memory_space<vmem>>, vector<6x4x32xbf16>,
    %c0_163 = arith.constant 0 : index
    %c0_164 = arith.constant 0 : index
    %c0_165 = arith.constant 0 : index
    %110 = vector.load %arg16[%c0_163, %c0_164, %c0_165] : memref<6x4x96xbf16, #tpu.memory_space<vmem>>, vector<4x4x96xbf16>
    %c0_166 = arith.constant 0 : index
    %c0_167 = arith.constant 0 : index
    %c0_168 = arith.constant 0 : index
    %111 = vector.load %arg6[%c0_166, %c0_167, %c0_168] : memref<3x96x8xbf16, #tpu.memory_space<vmem>>, vector<1x96x8xbf16>
    %112 = vector.shape_cast %111 : vector<1x96x8xbf16> to vector<96x8xbf16>
    %cst_169 = arith.constant dense<0.000000e+00> : vector<4x4x8xf32>
    %113 = tpu.matmul %110, %112, %cst_169 {dimension_numbers = #tpu.dot_dimension_numbers<[2], [0], [0, 1], [1], [0, 0, 0, 1, 1, 1], [], []>} : vector<4x4x96xbf16>, vector<96x8xbf16>, vector<4x4x8xf32> -> vector<4x4x8xf32>
    %c1_170 = arith.constant 1 : index
    %c0_171 = arith.constant 0 : index
    %c0_172 = arith.constant 0 : index
    %114 = vector.load %arg16[%c1_170, %c0_171, %c0_172] : memref<6x4x96xbf16, #tpu.memory_space<vmem>>, vector<4x4x96xbf16>
    %c1_173 = arith.constant 1 : index
    %c0_174 = arith.constant 0 : index
    %c0_175 = arith.constant 0 : index
    %115 = vector.load %arg6[%c1_173, %c0_174, %c0_175] : memref<3x96x8xbf16, #tpu.memory_space<vmem>>, vector<1x96x8xbf16>
    %116 = vector.shape_cast %115 : vector<1x96x8xbf16> to vector<96x8xbf16>
    %cst_176 = arith.constant dense<0.000000e+00> : vector<4x4x8xf32>
    %117 = tpu.matmul %114, %116, %cst_176 {dimension_numbers = #tpu.dot_dimension_numbers<[2], [0], [0, 1], [1], [0, 0, 0, 1, 1, 1], [], []>} : vector<4x4x96xbf16>, vector<96x8xbf16>, vector<4x4x8xf32> -> vector<4x4x8xf32>
    %118 = arith.addf %113, %117 : vector<4x4x8xf32>
    %c2_177 = arith.constant 2 : index
    %c0_178 = arith.constant 0 : index
    %c0_179 = arith.constant 0 : index
    %119 = vector.load %arg16[%c2_177, %c0_178, %c0_179] : memref<6x4x96xbf16, #tpu.memory_space<vmem>>, vector<4x4x96xbf16>
    %c2_180 = arith.constant 2 : index
    %c0_181 = arith.constant 0 : index
    %c0_182 = arith.constant 0 : index
    %120 = vector.load %arg6[%c2_180, %c0_181, %c0_182] : memref<3x96x8xbf16, #tpu.memory_space<vmem>>, vector<1x96x8xbf16>
    %121 = vector.shape_cast %120 : vector<1x96x8xbf16> to vector<96x8xbf16>
    %cst_183 = arith.constant dense<0.000000e+00> : vector<4x4x8xf32>
    %122 = tpu.matmul %119, %121, %cst_183 {dimension_numbers = #tpu.dot_dimension_numbers<[2], [0], [0, 1], [1], [0, 0, 0, 1, 1, 1], [], []>} : vector<4x4x96xbf16>, vector<96x8xbf16>, vector<4x4x8xf32> -> vector<4x4x8xf32>
    %123 = arith.addf %118, %122 : vector<4x4x8xf32>
    %c0_184 = arith.constant 0 : index
    %c0_185 = arith.constant 0 : index
    %124 = vector.load %arg7[%c0_184, %c0_185] : memref<1x8xf32, #tpu.memory_space<vmem>>, vector<1x8xf32>
    %125 = vector.shape_cast %124 : vector<1x8xf32> to vector<1x1x8xf32>
    %126 = vector.broadcast %125 : vector<1x1x8xf32> to vector<4x4x8xf32>
    %127 = arith.addf %123, %126 : vector<4x4x8xf32>
    %cst_186 = arith.constant 0.000000e+00 : f32
    %128 = vector.broadcast %cst_186 : f32 to vector<4x4x8xf32>
    %129 = arith.maximumf %127, %128 : vector<4x4x8xf32>
    %c0_187 = arith.constant 0 : index
    %c0_188 = arith.constant 0 : index
    %130 = vector.load %arg8[%c0_187, %c0_188] : memref<1x8xf32, #tpu.memory_space<vmem>>, vector<1x8xf32>
    %131 = vector.shape_cast %130 : vector<1x8xf32> to vector<1x1x8xf32>
    %132 = vector.broadcast %131 : vector<1x1x8xf32> to vector<4x4x8xf32>
    %133 = arith.mulf %129, %132 : vector<4x4x8xf32>
    %cst_189 = arith.constant dense<0.000000e+00> : vector<4x4xf32>
    %134 = vector.multi_reduction <add>, %133, %cst_189 [2] : vector<4x4x8xf32> to vector<4x4xf32>
    %c0_190 = arith.constant 0 : index
    %c0_191 = arith.constant 0 : index
    %135 = vector.load %arg9[%c0_190, %c0_191] : memref<1x1xf32, #tpu.memory_space<vmem>>, vector<1x1xf32>
    %136 = vector.broadcast %135 : vector<1x1xf32> to vector<4x4xf32>
    %137 = arith.addf %134, %136 : vector<4x4xf32>
    %138 = vector.extract_strided_slice %137 {offsets = [0, 0], sizes = [1, 4], strides = [1, 1]} : vector<4x4xf32> to vector<1x4xf32>
    %139 = vector.shape_cast %138 : vector<1x4xf32> to vector<1x1x4xf32>
    %c0_192 = arith.constant 0 : index
    %c0_193 = arith.constant 0 : index
    %c0_194 = arith.constant 0 : index
    %140 = vector.load %arg10[%c0_192, %c0_193, %c0_194] : memref<1x1x16xf32, #tpu.memory_space<vmem>>, vector<1x1x4xf32>
    tpu.vector_store %arg10[%c0_192, %c0_193, %c0_194], %139 {strides = array<i32>} : memref<1x1x16xf32, #tpu.memory_space<vmem>>, vector<1x1x4xf32>,
    %141 = vector.extract_strided_slice %137 {offsets = [1, 0], sizes = [1, 4], strides = [1, 1]} : vector<4x4xf32> to vector<1x4xf32>
    %142 = vector.shape_cast %141 : vector<1x4xf32> to vector<1x1x4xf32>
    %c0_195 = arith.constant 0 : index
    %c0_196 = arith.constant 0 : index
    %c4 = arith.constant 4 : index
    %143 = vector.load %arg10[%c0_195, %c0_196, %c4] : memref<1x1x16xf32, #tpu.memory_space<vmem>>, vector<1x1x4xf32>
    tpu.vector_store %arg10[%c0_195, %c0_196, %c4], %142 {strides = array<i32>} : memref<1x1x16xf32, #tpu.memory_space<vmem>>, vector<1x1x4xf32>,
    %144 = vector.extract_strided_slice %137 {offsets = [2, 0], sizes = [1, 4], strides = [1, 1]} : vector<4x4xf32> to vector<1x4xf32>
    %145 = vector.shape_cast %144 : vector<1x4xf32> to vector<1x1x4xf32>
    %c0_197 = arith.constant 0 : index
    %c0_198 = arith.constant 0 : index
    %c8 = arith.constant 8 : index
    %146 = vector.load %arg10[%c0_197, %c0_198, %c8] : memref<1x1x16xf32, #tpu.memory_space<vmem>>, vector<1x1x4xf32>
    tpu.vector_store %arg10[%c0_197, %c0_198, %c8], %145 {strides = array<i32>} : memref<1x1x16xf32, #tpu.memory_space<vmem>>, vector<1x1x4xf32>,
    %147 = vector.extract_strided_slice %137 {offsets = [3, 0], sizes = [1, 4], strides = [1, 1]} : vector<4x4xf32> to vector<1x4xf32>
    %148 = vector.shape_cast %147 : vector<1x4xf32> to vector<1x1x4xf32>
    %c0_199 = arith.constant 0 : index
    %c0_200 = arith.constant 0 : index
    %c12 = arith.constant 12 : index
    %149 = vector.load %arg10[%c0_199, %c0_200, %c12] : memref<1x1x16xf32, #tpu.memory_space<vmem>>, vector<1x1x4xf32>
    tpu.vector_store %arg10[%c0_199, %c0_200, %c12], %148 {strides = array<i32>} : memref<1x1x16xf32, #tpu.memory_space<vmem>>, vector<1x1x4xf32>,
    return
  }
  func.func @transform_0(%arg0: i32) -> (i32, i32, i32, i32) {
    %c0_i32 = arith.constant 0 : i32
    %c0_i32_0 = arith.constant 0 : i32
    %c0_i32_1 = arith.constant 0 : i32
    %c0_i32_2 = arith.constant 0 : i32
    return %arg0, %c0_i32, %c0_i32_0, %c0_i32_1 : i32, i32, i32, i32
  }
  func.func @transform_1(%arg0: i32) -> (i32, i32, i32) {
    %c0_i32 = arith.constant 0 : i32
    %c0_i32_0 = arith.constant 0 : i32
    %c0_i32_1 = arith.constant 0 : i32
    %c0_i32_2 = arith.constant 0 : i32
    return %c0_i32, %c0_i32_0, %c0_i32_1 : i32, i32, i32
  }
  func.func @transform_2(%arg0: i32) -> (i32, i32) {
    %c0_i32 = arith.constant 0 : i32
    %c0_i32_0 = arith.constant 0 : i32
    %c0_i32_1 = arith.constant 0 : i32
    return %c0_i32, %c0_i32_0 : i32, i32
  }
  func.func @transform_3(%arg0: i32) -> (i32, i32, i32) {
    %c0_i32 = arith.constant 0 : i32
    %c0_i32_0 = arith.constant 0 : i32
    %c0_i32_1 = arith.constant 0 : i32
    %c0_i32_2 = arith.constant 0 : i32
    return %c0_i32, %c0_i32_0, %c0_i32_1 : i32, i32, i32
  }
  func.func @transform_4(%arg0: i32) -> (i32, i32) {
    %c0_i32 = arith.constant 0 : i32
    %c0_i32_0 = arith.constant 0 : i32
    %c0_i32_1 = arith.constant 0 : i32
    return %c0_i32, %c0_i32_0 : i32, i32
  }
  func.func @transform_5(%arg0: i32) -> (i32, i32, i32) {
    %c0_i32 = arith.constant 0 : i32
    %c0_i32_0 = arith.constant 0 : i32
    %c0_i32_1 = arith.constant 0 : i32
    %c0_i32_2 = arith.constant 0 : i32
    return %c0_i32, %c0_i32_0, %c0_i32_1 : i32, i32, i32
  }
  func.func @transform_6(%arg0: i32) -> (i32, i32) {
    %c0_i32 = arith.constant 0 : i32
    %c0_i32_0 = arith.constant 0 : i32
    %c0_i32_1 = arith.constant 0 : i32
    return %c0_i32, %c0_i32_0 : i32, i32
  }
  func.func @transform_7(%arg0: i32) -> (i32, i32) {
    %c0_i32 = arith.constant 0 : i32
    %c0_i32_0 = arith.constant 0 : i32
    %c0_i32_1 = arith.constant 0 : i32
    return %c0_i32, %c0_i32_0 : i32, i32
  }
  func.func @transform_8(%arg0: i32) -> (i32, i32) {
    %c0_i32 = arith.constant 0 : i32
    %c0_i32_0 = arith.constant 0 : i32
    %c0_i32_1 = arith.constant 0 : i32
    return %c0_i32, %c0_i32_0 : i32, i32
  }
  func.func @transform_9(%arg0: i32) -> (i32, i32, i32) {
    %c0_i32 = arith.constant 0 : i32
    %c0_i32_0 = arith.constant 0 : i32
    %c0_i32_1 = arith.constant 0 : i32
    return %arg0, %c0_i32, %c0_i32_0 : i32, i32, i32
  }
}

</mosaic_0001>

<bundles_post_ra>
// kernel: model_forward.1
= control target key start
LH: loop header
LB: loop body
LE: loop exit
PB: predicated region body
PF: predicated region fallthrough
CT: control target
= control target key end

     0   :  { %s3819_s11 = smov 0   ;;  %s4620_s0 = inlined_call_operand.vmem [shape: f32[2,16,16,3], index: 0, kind: input, shape index: {}]   ;;  %s4621_s1 = inlined_call_operand.vmem [shape: bf16[3,9,16], index: 1, kind: input, shape index: {}]   ;;  %s4622_s2 = inlined_call_operand.vmem [shape: f32[1,16], index: 2, kind: input, shape index: {}]   ;;  %s4623_s3 = inlined_call_operand.vmem [shape: bf16[3,48,32], index: 3, kind: input, shape index: {}]   ;;  %s4624_s4 = inlined_call_operand.vmem [shape: f32[1,32], index: 4, kind: input, shape index: {}]   ;;  %s4625_s5 = inlined_call_operand.vmem [shape: bf16[3,96,8], index: 5, kind: input, shape index: {}]   ;;  %s4626_s6 = inlined_call_operand.vmem [shape: f32[1,8], index: 6, kind: input, shape index: {}]   ;;  %s4627_s7 = inlined_call_operand.vmem [shape: f32[1,8], index: 7, kind: input, shape index: {}]   ;;  %s4628_s8 = inlined_call_operand.<no memory space> [shape: f32[1,1], index: 8, kind: input, shape index: {}]   ;;  %s4629_s9 = inlined_call_operand.vmem [shape: f32[2,1,16], index: 9, kind: output, shape index: {}]  }
   0x1   :  { %v14_v0 = vstv %s4628_s8 }
   0x2   :  { %15 = vst [vmem:[#allocation10] sm:$0x1] %v14_v0 }
   0x3 LB: > { %s3115_s12 = sadd.s32 4294967295, %s3754_s11   ;;  %p3119_p0 = scmp.ge.s32.totalorder %s3754_s11, 1  ;;  %s3754_s11 = sphi %s3819_s11, %s21_s11  }
   0x4   : > { %p289_p1 = scmp.lt.s32.totalorder %s3754_s11, 3 }
   0x6   : > { %p290_p2 = pnand %p3119_p0, %p289_p1 }
   0x7   : > { %p3829_p3 = scmp.lt.s32.totalorder (!%p290_p2), %s3115_s12, 1  ;;  %vm332_vm0 = vcmask (!%p290_p2), 23552   ;;  %vm341_vm1 = vcmask (!%p290_p2), 16384   ;;  %vm335_vm2 = vcmask (!%p290_p2), 17408   ;;  %v3756_v1 = vmov (!%p290_p2), 0.0   ;;  %s3757_s17 = smov (!%p290_p2), 3  }
   0x8   : > { %293 = sbr.rel (%p290_p2) target bundleno = 1515 (0x5eb), region = 56  ;;  %361 = vst.msk [vmem:[#allocation2 + $0x29] sm:$0x1] (!%p290_p2), %vm341_vm1, %v3756_v1  ;;  %343 = vst.msk [vmem:[#allocation2 + $0x18] sm:$0x1] (!%p290_p2), %vm341_vm1, %v3756_v1  ;;  %s3758_s18 = smov (!%p290_p2), 6  }
   0x9   : > { %333 = vst.msk [vmem:[#allocation2] sm:$0xff] (!%p290_p2), %vm332_vm0, %v3756_v1  ;;  %334 = vst.msk [vmem:[#allocation2 + $0x8] sm:$0xff] (!%p290_p2), %vm332_vm0, %v3756_v1  ;;  %vm897_vm3 = vcmask (!%p290_p2), 1043456   ;;  %vm898_vm4 = vcmask (!%p290_p2), 1044480   ;;  %v3759_v57 = vmov (!%p290_p2), 65535   ;;  %vm641_vm5 = vcmask (!%p290_p2), 48152  }
   0xa   : > { %338 = vst.msk [vmem:[#allocation2 + $0x198] sm:$0xff] (!%p290_p2), %vm332_vm0, %v3756_v1  ;;  %339 = vst.msk [vmem:[#allocation2 + $0x1a0] sm:$0xff] (!%p290_p2), %vm332_vm0, %v3756_v1  ;;  %v899_v58 = vsel (!%p290_p2), %vm897_vm3, 4294967295, %v3759_v57  ;;  %vm786_vm6 = vcmask (!%p290_p2), 72752   ;;  %vm848_vm7 = vcmask (!%p290_p2), 72704   ;;  %vm1622_vm8 = vcmask (!%p290_p2), 130048  }
   0xb   : > { %344 = vst.msk [vmem:[#allocation2 + $0x30] sm:$0x1] (!%p290_p2), %vm341_vm1, %v3756_v1  ;;  %345 = vst.msk [vmem:[#allocation2 + $0x48] sm:$0x1] (!%p290_p2), %vm341_vm1, %v3756_v1  ;;  %vm1629_vm9 = vcmask (!%p290_p2), 122880   ;;  %vm1624_vm10 = vcmask (!%p290_p2), 123904  }
   0xc   : > { %346 = vst.msk [vmem:[#allocation2 + $0x60] sm:$0x1] (!%p290_p2), %vm341_vm1, %v3756_v1  ;;  %347 = vst.msk [vmem:[#allocation2 + $0x78] sm:$0x1] (!%p290_p2), %vm341_vm1, %v3756_v1  ;;  %vm1750_vm11 = vcmask (!%p290_p2), 125952   ;;  %s3760_s27 = smov (!%p290_p2), 16  }
   0xd   : > { %348 = vst.msk [vmem:[#allocation2 + $0x90] sm:$0x1] (!%p290_p2), %vm341_vm1, %v3756_v1  ;;  %349 = vst.msk [vmem:[#allocation2 + $0xa8] sm:$0x1] (!%p290_p2), %vm341_vm1, %v3756_v1  ;;  %s3761_s28 = smov (!%p290_p2), 32   ;;  %vm1841_vm12 = vcmask (!%p290_p2), 257152  }
   0xe   : > { %350 = vst.msk [vmem:[#allocation2 + $0xc0] sm:$0x1] (!%p290_p2), %vm341_vm1, %v3756_v1  ;;  %351 = vst.msk [vmem:[#allocation2 + $0xd8] sm:$0x1] (!%p290_p2), %vm341_vm1, %v3756_v1  ;;  %vm1932_vm13 = vcmask (!%p290_p2), 388352   ;;  %vm2011_vm14 = vcmask (!%p290_p2), 392192  }
   0xf   : > { %352 = vst.msk [vmem:[#allocation2 + $0xf0] sm:$0x1] %vm341_vm1, %v3756_v1  ;;  %353 = vst.msk [vmem:[#allocation2 + $0x108] sm:$0x1] %vm341_vm1, %v3756_v1  ;;  %s4632_s12 = smov (!%p3829_p3, %s3115_s12), 1  ;;  %vm2370_vm15 = vcmask 253952  }
  0x10   : > { %354 = vst.msk [vmem:[#allocation2 + $0x120] sm:$0x1] %vm341_vm1, %v3756_v1  ;;  %355 = vst.msk [vmem:[#allocation2 + $0x138] sm:$0x1] %vm341_vm1, %v3756_v1  ;;  %s3294_s13 = sshll.u32 %s4632_s12, 8  ;;  %vm2429_vm3 = vcmask 254976  }
  0x11   : > { %356 = vst.msk [vmem:[#allocation2 + $0x150] sm:$0x1] %vm341_vm1, %v3756_v1  ;;  %357 = vst.msk [vmem:[#allocation2 + $0x168] sm:$0x1] %vm341_vm1, %v3756_v1  ;;  %s3927_s16 = scalar_lea.vmem %s4620_s0, %s3294_s13  ;;  %s330_s13 = scalar_lea.vmem %s4629_s9, %s4632_s12 }
  0x12   : > { %358 = vst.msk [vmem:[#allocation2 + $0x180] sm:$0x1] %vm341_vm1, %v3756_v1  ;;  %362 = vst.msk [vmem:[#allocation2 + $0x41] sm:$0x1] %vm341_vm1, %v3756_v1  ;;  %v378_v2 = vld [vmem:[%s3927_s16] sm:$0xff]  ;;  %v379_v3 = vld [vmem:[%s3927_s16 + $0x8] sm:$0xff] }
  0x13   : > { %363 = vst.msk [vmem:[#allocation2 + $0x59] sm:$0x1] %vm341_vm1, %v3756_v1  ;;  %364 = vst.msk [vmem:[#allocation2 + $0x71] sm:$0x1] %vm341_vm1, %v3756_v1  ;;  %v380_v4 = vld [vmem:[%s3927_s16 + $0x10] sm:$0xff]  ;;  %v381_v5 = vld [vmem:[%s3927_s16 + $0x18] sm:$0xff] }
  0x14   : > { %365 = vst.msk [vmem:[#allocation2 + $0x89] sm:$0x1] %vm341_vm1, %v3756_v1  ;;  %366 = vst.msk [vmem:[#allocation2 + $0xa1] sm:$0x1] %vm341_vm1, %v3756_v1  ;;  %v382_v6 = vld [vmem:[%s3927_s16 + $0x20] sm:$0xff]  ;;  %v383_v7 = vld [vmem:[%s3927_s16 + $0x28] sm:$0xff] }
  0x15   : > { %367 = vst.msk [vmem:[#allocation2 + $0xb9] sm:$0x1] %vm341_vm1, %v3756_v1  ;;  %368 = vst.msk [vmem:[#allocation2 + $0xd1] sm:$0x1] %vm341_vm1, %v3756_v1  ;;  %v384_v8 = vld [vmem:[%s3927_s16 + $0x30] sm:$0xff]  ;;  %v385_v9 = vld [vmem:[%s3927_s16 + $0x38] sm:$0xff] }
  0x16   : > { %369 = vst.msk [vmem:[#allocation2 + $0xe9] sm:$0x1] %vm341_vm1, %v3756_v1  ;;  %370 = vst.msk [vmem:[#allocation2 + $0x101] sm:$0x1] %vm341_vm1, %v3756_v1  ;;  %v386_v10 = vld [vmem:[%s3927_s16 + $0x40] sm:$0xff]  ;;  %v387_v11 = vld [vmem:[%s3927_s16 + $0x48] sm:$0xff] }
  0x17   : > { %371 = vst.msk [vmem:[#allocation2 + $0x119] sm:$0x1] %vm341_vm1, %v3756_v1  ;;  %372 = vst.msk [vmem:[#allocation2 + $0x131] sm:$0x1] %vm341_vm1, %v3756_v1  ;;  %v388_v12 = vld [vmem:[%s3927_s16 + $0x50] sm:$0xff]  ;;  %v389_v13 = vld [vmem:[%s3927_s16 + $0x58] sm:$0xff] }
  0x18   : > { %373 = vst.msk [vmem:[#allocation2 + $0x149] sm:$0x1] %vm341_vm1, %v3756_v1  ;;  %374 = vst.msk [vmem:[#allocation2 + $0x161] sm:$0x1] %vm341_vm1, %v3756_v1  ;;  %v390_v14 = vld [vmem:[%s3927_s16 + $0x60] sm:$0xff]  ;;  %v391_v15 = vld [vmem:[%s3927_s16 + $0x68] sm:$0xff] }
  0x19   : > { %375 = vst.msk [vmem:[#allocation2 + $0x179] sm:$0x1] %vm341_vm1, %v3756_v1  ;;  %376 = vst.msk [vmem:[#allocation2 + $0x191] sm:$0x1] %vm341_vm1, %v3756_v1  ;;  %v392_v16 = vld [vmem:[%s3927_s16 + $0x70] sm:$0xff]  ;;  %v393_v17 = vld [vmem:[%s3927_s16 + $0x78] sm:$0xff] }
  0x1a   : > { %336 = vst.msk [vmem:[#allocation2 + $0x10] sm:$0x3] %vm335_vm2, %v3756_v1  ;;  %340 = vst.msk [vmem:[#allocation2 + $0x1a8] sm:$0x3] %vm335_vm2, %v3756_v1  ;;  %v394_v18 = vld [vmem:[%s3927_s16 + $0x80] sm:$0xff]  ;;  %v395_v19 = vld [vmem:[%s3927_s16 + $0x88] sm:$0xff] }
  0x1b   : > { %342 = vst.msk [vmem:[#allocation2] sm:$0x1] %vm341_vm1, %v3756_v1  ;;  %359 = vst.msk [vmem:[#allocation2 + $0x198] sm:$0x1] %vm341_vm1, %v3756_v1  ;;  %v396_v20 = vld [vmem:[%s3927_s16 + $0x90] sm:$0xff]  ;;  %v397_v21 = vld [vmem:[%s3927_s16 + $0x98] sm:$0xff] }
  0x1c   : > { %360 = vst.msk [vmem:[#allocation2 + $0x11] sm:$0x1] %vm341_vm1, %v3756_v1  ;;  %377 = vst.msk [vmem:[#allocation2 + $0x1a9] sm:$0x1] %vm341_vm1, %v3756_v1  ;;  %v398_v48 = vld [vmem:[%s3927_s16 + $0xa0] sm:$0xff]  ;;  %v399_v51 = vld [vmem:[%s3927_s16 + $0xa8] sm:$0xff] }
  0x1d   : > { %411 = vst.msk [vmem:[#allocation2 + $0x19] sm:$0xff] %vm332_vm0, %v378_v2  ;;  %412 = vst.msk [vmem:[#allocation2 + $0x21] sm:$0xff] %vm332_vm0, %v379_v3  ;;  %v400_v54 = vld [vmem:[%s3927_s16 + $0xb0] sm:$0xff]  ;;  %v401_v55 = vld [vmem:[%s3927_s16 + $0xb8] sm:$0xff]  ;;  %vm2387_vm1 = vcmask 261120   ;;  %vm2412_vm2 = vcmask 257024  }
  0x1e   : > { %413 = vst.msk [vmem:[#allocation2 + $0x31] sm:$0xff] %vm332_vm0, %v380_v4  ;;  %414 = vst.msk [vmem:[#allocation2 + $0x39] sm:$0xff] %vm332_vm0, %v381_v5  ;;  %v402_v56 = vld [vmem:[%s3927_s16 + $0xc0] sm:$0xff]  ;;  %v403_v62 = vld [vmem:[%s3927_s16 + $0xc8] sm:$0xff] }
  0x1f   : > { %415 = vst.msk [vmem:[#allocation2 + $0x49] sm:$0xff] %vm332_vm0, %v382_v6  ;;  %416 = vst.msk [vmem:[#allocation2 + $0x51] sm:$0xff] %vm332_vm0, %v383_v7  ;;  %v404_v63 = vld [vmem:[%s3927_s16 + $0xd0] sm:$0xff]  ;;  %v405_v0 = vld [vmem:[%s3927_s16 + $0xd8] sm:$0xff] }
  0x20   : > { %417 = vst.msk [vmem:[#allocation2 + $0x61] sm:$0xff] %vm332_vm0, %v384_v8  ;;  %418 = vst.msk [vmem:[#allocation2 + $0x69] sm:$0xff] %vm332_vm0, %v385_v9  ;;  %v406_v3 = vld [vmem:[%s3927_s16 + $0xe0] sm:$0xff]  ;;  %v407_v4 = vld [vmem:[%s3927_s16 + $0xe8] sm:$0xff]  ;;  %v3999_v9 = vsel %vm898_vm4, %v899_v58, 0  ;;  %vm3764_vm4 = vmmov 0  }
  0x21   : > { %419 = vst.msk [vmem:[#allocation2 + $0x79] sm:$0xff] %vm332_vm0, %v386_v10  ;;  %420 = vst.msk [vmem:[#allocation2 + $0x81] sm:$0xff] %vm332_vm0, %v387_v11  ;;  %v515_v10 = vld [vmem:[#allocation2 + $0x1] sm:$0xff] }
  0x22   : > { %421 = vst.msk [vmem:[#allocation2 + $0x91] sm:$0xff] %vm332_vm0, %v388_v12  ;;  %422 = vst.msk [vmem:[#allocation2 + $0x99] sm:$0xff] %vm332_vm0, %v389_v13 }
  0x23   : > { %423 = vst.msk [vmem:[#allocation2 + $0xa9] sm:$0xff] %vm332_vm0, %v390_v14  ;;  %424 = vst.msk [vmem:[#allocation2 + $0xb1] sm:$0xff] %vm332_vm0, %v391_v15  ;;  %v3706_v15 = vld [vmem:[%s4621_s1 + $0x8] sm:$0x1f]  }
  0x24   : > { %425 = vst.msk [vmem:[#allocation2 + $0xc1] sm:$0xff] %vm332_vm0, %v392_v16  ;;  %426 = vst.msk [vmem:[#allocation2 + $0xc9] sm:$0xff] %vm332_vm0, %v393_v17  ;;  %v517_v22 = vld [vmem:[#allocation2 + $0x19] sm:$0xff]  ;;  %v518_v23 = vld [vmem:[#allocation2 + $0x21] sm:$0xff] }
  0x25   : > { %427 = vst.msk [vmem:[#allocation2 + $0xd9] sm:$0xff] %vm332_vm0, %v394_v18  ;;  %v662_v24 = vld [vmem:[#allocation2 + $0x1a] sm:$0xff]  ;;  %428 = vst.msk [vmem:[#allocation2 + $0xe1] sm:$0xff] %vm332_vm0, %v395_v19  ;;  %v552_v25 = vpack.c.bf16 %v518_v23, %v517_v22  ;;  %v663_v26 = vld [vmem:[#allocation2 + $0x22] sm:$0xff]  ;;  %v902_v23 = vand.u32 %v3706_v15, %v3999_v9 }
  0x26   : > { %429 = vst.msk [vmem:[#allocation2 + $0xf1] sm:$0xff] %vm332_vm0, %v396_v20  ;;  %430 = vst.msk [vmem:[#allocation2 + $0xf9] sm:$0xff] %vm332_vm0, %v397_v21  ;;  %v519_v27 = vld [vmem:[#allocation2 + $0x31] sm:$0xff]  ;;  %v520_v28 = vld [vmem:[#allocation2 + $0x39] sm:$0xff]  ;;  %v697_v29 = vpack.c.bf16 %v663_v26, %v662_v24 }
  0x27   : > { %v664_v30 = vld [vmem:[#allocation2 + $0x32] sm:$0xff]  ;;  %v665_v31 = vld [vmem:[#allocation2 + $0x3a] sm:$0xff]  ;;  %589 = vrot.lane.b32.xlu0 %v552_v25, %s3757_s17  ;;  %v553_v32 = vpack.c.bf16 %v520_v28, %v519_v27  ;;  %v521_v34 = vld [vmem:[#allocation2 + $0x49] sm:$0xff]  ;;  %431 = vst.msk [vmem:[#allocation2 + $0x109] sm:$0xff] %vm332_vm0, %v398_v48  ;;  %3408 = vmatprep.subr.bf16.mxu0 %v902_v23 }
  0x28   : > { %734 = vrot.lane.b32.xlu1 %v697_v29, %s3758_s18  ;;  %v698_v33 = vpack.c.bf16 %v665_v31, %v664_v30  ;;  %v522_v35 = vld [vmem:[#allocation2 + $0x51] sm:$0xff]  ;;  %v523_v36 = vld [vmem:[#allocation2 + $0x61] sm:$0xff]  ;;  %v524_v37 = vld [vmem:[#allocation2 + $0x69] sm:$0xff]  ;;  %432 = vst.msk [vmem:[#allocation2 + $0x111] sm:$0xff] %vm332_vm0, %v399_v51  ;;  %3600 = vmatprep.subr.bf16.mxu1 %v902_v23 }
  0x29   : > { %v554_v38 = vpack.c.bf16 %v522_v35, %v521_v34  ;;  %v555_v39 = vpack.c.bf16 %v524_v37, %v523_v36  ;;  %v666_v40 = vld [vmem:[#allocation2 + $0x4a] sm:$0xff]  ;;  %v667_v41 = vld [vmem:[#allocation2 + $0x52] sm:$0xff]  ;;  %v668_v42 = vld [vmem:[#allocation2 + $0x62] sm:$0xff]  ;;  %433 = vst.msk [vmem:[#allocation2 + $0x121] sm:$0xff] %vm332_vm0, %v400_v54  ;;  %3409 = vmatpush3.bf16.msra.mxu0 %v902_v23  ;;  %3601 = vmatpush3.bf16.msra.mxu1 %v902_v23 }
  0x2a   : > { %v669_v43 = vld [vmem:[#allocation2 + $0x6a] sm:$0xff]  ;;  %v699_v44 = vpack.c.bf16 %v667_v41, %v666_v40  ;;  %v525_v46 = vld [vmem:[#allocation2 + $0x79] sm:$0xff]  ;;  %v526_v47 = vld [vmem:[#allocation2 + $0x81] sm:$0xff]  ;;  %434 = vst.msk [vmem:[#allocation2 + $0x129] sm:$0xff] %vm332_vm0, %v401_v55 }
  0x2b   : > { %591 = vrot.lane.b32.xlu0 %v553_v32, %s3757_s17  ;;  %v700_v45 = vpack.c.bf16 %v669_v43, %v668_v42  ;;  %v527_v49 = vld [vmem:[#allocation2 + $0x91] sm:$0xff]  ;;  %v528_v50 = vld [vmem:[#allocation2 + $0x99] sm:$0xff]  ;;  %v671_v53 = vld [vmem:[#allocation2 + $0x82] sm:$0xff]  ;;  %v556_v59 = vpack.c.bf16 %v526_v47, %v525_v46  ;;  %435 = vst.msk [vmem:[#allocation2 + $0x139] sm:$0xff] %vm332_vm0, %v402_v56 }
  0x2c   : > { %736 = vrot.lane.b32.xlu1 %v698_v33, %s3758_s18  ;;  %v670_v52 = vld [vmem:[#allocation2 + $0x7a] sm:$0xff]  ;;  %v672_v60 = vld [vmem:[#allocation2 + $0x92] sm:$0xff]  ;;  %v557_v2 = vpack.c.bf16 %v528_v50, %v527_v49  ;;  %436 = vst.msk [vmem:[#allocation2 + $0x141] sm:$0xff] %vm332_vm0, %v403_v62  ;;  %437 = vst.msk [vmem:[#allocation2 + $0x151] sm:$0xff] %vm332_vm0, %v404_v63 }
  0x2d   : > { %v673_v61 = vld [vmem:[#allocation2 + $0x9a] sm:$0xff]  ;;  %438 = vst.msk [vmem:[#allocation2 + $0x159] sm:$0xff] %vm332_vm0, %v405_v0  ;;  %439 = vst.msk [vmem:[#allocation2 + $0x169] sm:$0xff] %vm332_vm0, %v406_v3  ;;  %v447_v7 = vld [vmem:[#allocation2 + $0x30] sm:$0xff]  ;;  %v701_v16 = vpack.c.bf16 %v671_v53, %v670_v52 }
  0x2e   : > { %v445_v5 = vld [vmem:[#allocation2 + $0x18] sm:$0xff]  ;;  %440 = vst.msk [vmem:[#allocation2 + $0x171] sm:$0xff] %vm332_vm0, %v407_v4  ;;  %v446_v6 = vld [vmem:[#allocation2 + $0x20] sm:$0xff]  ;;  %v449_v13 = vld [vmem:[#allocation2 + $0x48] sm:$0xff]  ;;  %v702_v21 = vpack.c.bf16 %v673_v61, %v672_v60 }
  0x2f   : > { %593 = vrot.lane.b32.xlu0 %v554_v38, %s3757_s17  ;;  %v448_v8 = vld [vmem:[#allocation2 + $0x38] sm:$0xff]  ;;  %v480_v11 = vpack.c.bf16 %v446_v6, %v445_v5  ;;  %v450_v14 = vld [vmem:[#allocation2 + $0x50] sm:$0xff]  ;;  %v451_v18 = vld [vmem:[#allocation2 + $0x60] sm:$0xff]  ;;  %1623 = vst.msk [vmem:[#allocation4] sm:$0xff] %vm1622_vm8, %v3756_v1 }
  0x30   : > { %595 = vrot.lane.b32.xlu1 %v555_v39, %s3757_s17  ;;  %v481_v12 = vpack.c.bf16 %v448_v8, %v447_v7  ;;  %v482_v17 = vpack.c.bf16 %v450_v14, %v449_v13  ;;  %v452_v19 = vld [vmem:[#allocation2 + $0x68] sm:$0xff]  ;;  %v3707_v20 = vld [vmem:[%s4621_s1] sm:$0x1f]   ;;  %v453_v25 = vld [vmem:[#allocation2 + $0x78] sm:$0xff]  ;;  %1627 = vst.msk [vmem:[#allocation4 + $0x90] sm:$0xff] %vm1622_vm8, %v3756_v1 }
  0x31   : > { %v516_v22 = vld [vmem:[#allocation2 + $0x9] sm:$0xff]  ;;  %498 = vst.msk [vmem:[#allocation3 + $0x8] sm:$0xff] %vm332_vm0, %v480_v11  ;;  %v483_v24 = vpack.c.bf16 %v452_v19, %v451_v18  ;;  %v454_v26 = vld [vmem:[#allocation2 + $0x80] sm:$0xff]  ;;  %v4014_v29 = vand.u32 %v3707_v20, %v3999_v9  ;;  %v530_v34 = vld [vmem:[#allocation2 + $0xb1] sm:$0xff] }
  0x32   : > { %499 = vst.msk [vmem:[#allocation3 + $0x10] sm:$0xff] %vm332_vm0, %v481_v12  ;;  %v660_v27 = vld [vmem:[#allocation2 + $0x2] sm:$0xff]  ;;  %v661_v28 = vld [vmem:[#allocation2 + $0xa] sm:$0xff]  ;;  %500 = vst.msk [vmem:[#allocation3 + $0x18] sm:$0xff] %vm332_vm0, %v482_v17  ;;  %v484_v30 = vpack.c.bf16 %v454_v26, %v453_v25  ;;  %v551_v31 = vpack.c.bf16 %v516_v22, %v515_v10 }
  0x33   : > { %738 = vrot.lane.b32.xlu0 %v699_v44, %s3758_s18  ;;  %501 = vst.msk [vmem:[#allocation3 + $0x20] sm:$0xff] %vm332_vm0, %v483_v24  ;;  %v696_v32 = vpack.c.bf16 %v661_v28, %v660_v27  ;;  %v529_v33 = vld [vmem:[#allocation2 + $0xa9] sm:$0xff]  ;;  %3442 = vmatprep.subr.bf16.mxu0 %v4014_v29  ;;  %v675_v36 = vld [vmem:[#allocation2 + $0xb2] sm:$0xff]  ;;  %v531_v37 = vld [vmem:[#allocation2 + $0xc1] sm:$0xff] }
  0x34   : > { %740 = vrot.lane.b32.xlu1 %v700_v45, %s3758_s18  ;;  %502 = vst.msk [vmem:[#allocation3 + $0x28] sm:$0xff] %vm332_vm0, %v484_v30  ;;  %v674_v35 = vld [vmem:[#allocation2 + $0xaa] sm:$0xff]  ;;  %v558_v38 = vpack.c.bf16 %v530_v34, %v529_v33  ;;  %v456_v41 = vld [vmem:[#allocation2 + $0x98] sm:$0xff]  ;;  %v443_v46 = vld [vmem:[#allocation2] sm:$0xff] }
  0x35   : > { %v532_v39 = vld [vmem:[#allocation2 + $0xc9] sm:$0xff]  ;;  %v703_v42 = vpack.c.bf16 %v675_v36, %v674_v35  ;;  %v409_v45 = vld [vmem:[%s3927_s16 + $0xf8] sm:$0xff]  ;;  %v534_v48 = vld [vmem:[#allocation2 + $0xe1] sm:$0xff]  ;;  %1641 = vst.msk [vmem:[#allocation4 + $0x19] sm:$0x1] %vm1629_vm9, %v3756_v1 }
  0x36   : > { %v455_v40 = vld [vmem:[#allocation2 + $0x90] sm:$0xff]  ;;  %v533_v47 = vld [vmem:[#allocation2 + $0xd9] sm:$0xff]  ;;  %442 = vst.msk [vmem:[#allocation2 + $0x189] sm:$0xff] %vm332_vm0, %v409_v45  ;;  %v444_v49 = vld [vmem:[#allocation2 + $0x8] sm:$0xff]  ;;  %v559_v53 = vpack.c.bf16 %v532_v39, %v531_v37 }
  0x37   : > { %597 = vrot.lane.b32.xlu0 %v556_v59, %s3757_s17  ;;  %v485_v43 = vpack.c.bf16 %v456_v41, %v455_v40  ;;  %v408_v44 = vld [vmem:[%s3927_s16 + $0xf0] sm:$0xff]  ;;  %v676_v50 = vld [vmem:[#allocation2 + $0xc2] sm:$0xff]  ;;  %v479_v52 = vpack.c.bf16 %v444_v49, %v443_v46  ;;  %v678_v54 = vld [vmem:[#allocation2 + $0xda] sm:$0xff]  ;;  %v560_v56 = vpack.c.bf16 %v534_v48, %v533_v47  ;;  %1630 = vst.msk [vmem:[#allocation4] sm:$0x1] %vm1629_vm9, %v3756_v1 }
  0x38   : > { %599 = vrot.lane.b32.xlu1 %v557_v2, %s3757_s17  ;;  %441 = vst.msk [vmem:[#allocation2 + $0x181] sm:$0xff] %vm332_vm0, %v408_v44  ;;  %v677_v51 = vld [vmem:[#allocation2 + $0xca] sm:$0xff]  ;;  %v679_v55 = vld [vmem:[#allocation2 + $0xe2] sm:$0xff]  ;;  %v536_v60 = vld [vmem:[#allocation2 + $0xf9] sm:$0xff] }
  0x39   : > { %503 = vst.msk [vmem:[#allocation3 + $0x30] sm:$0xff] %vm332_vm0, %v485_v43  ;;  %497 = vst.msk [vmem:[#allocation3] sm:$0xff] %vm332_vm0, %v479_v52  ;;  %v704_v57 = vpack.c.bf16 %v677_v51, %v676_v50  ;;  %v705_v58 = vpack.c.bf16 %v679_v55, %v678_v54  ;;  %v535_v59 = vld [vmem:[#allocation2 + $0xf1] sm:$0xff]  ;;  %v537_v61 = vld [vmem:[#allocation2 + $0x109] sm:$0xff] }
  0x3a   : > { %v538_v62 = vld [vmem:[#allocation2 + $0x111] sm:$0xff]  ;;  %v457_v63 = vld [vmem:[#allocation2 + $0xa8] sm:$0xff]  ;;  %v681_v3 = vld [vmem:[#allocation2 + $0xfa] sm:$0xff]  ;;  %v561_v7 = vpack.c.bf16 %v536_v60, %v535_v59  ;;  %1631 = vst.msk [vmem:[#allocation4 + $0x10] sm:$0x1] %vm1629_vm9, %v3756_v1 }
  0x3b   : > { %742 = vrot.lane.b32.xlu0 %v701_v16, %s3758_s18  ;;  %v458_v0 = vld [vmem:[#allocation2 + $0xb0] sm:$0xff]  ;;  %v459_v5 = vld [vmem:[#allocation2 + $0xc0] sm:$0xff]  ;;  %v460_v6 = vld [vmem:[#allocation2 + $0xc8] sm:$0xff]  ;;  %v562_v12 = vpack.c.bf16 %v538_v62, %v537_v61  ;;  %1632 = vst.msk [vmem:[#allocation4 + $0x20] sm:$0x1] %vm1629_vm9, %v3756_v1 }
  0x3c   : > { %744 = vrot.lane.b32.xlu1 %v702_v21, %s3758_s18  ;;  %v680_v2 = vld [vmem:[#allocation2 + $0xf2] sm:$0xff]  ;;  %v486_v4 = vpack.c.bf16 %v458_v0, %v457_v63  ;;  %v682_v8 = vld [vmem:[#allocation2 + $0x10a] sm:$0xff]  ;;  %v487_v11 = vpack.c.bf16 %v460_v6, %v459_v5  ;;  %v539_v13 = vld [vmem:[#allocation2 + $0x121] sm:$0xff]  ;;  %1633 = vst.msk [vmem:[#allocation4 + $0x30] sm:$0x1] %vm1629_vm9, %v3756_v1 }
  0x3d   : > { %v683_v10 = vld [vmem:[#allocation2 + $0x112] sm:$0xff]  ;;  %v540_v14 = vld [vmem:[#allocation2 + $0x129] sm:$0xff]  ;;  %v706_v15 = vpack.c.bf16 %v681_v3, %v680_v2  ;;  %v542_v17 = vld [vmem:[#allocation2 + $0x141] sm:$0xff]  ;;  %1634 = vst.msk [vmem:[#allocation4 + $0x40] sm:$0x1] %vm1629_vm9, %v3756_v1 }
  0x3e   : > { %504 = vst.msk [vmem:[#allocation3 + $0x38] sm:$0xff] %vm332_vm0, %v486_v4  ;;  %505 = vst.msk [vmem:[#allocation3 + $0x40] sm:$0xff] %vm332_vm0, %v487_v11  ;;  %v541_v16 = vld [vmem:[#allocation2 + $0x139] sm:$0xff]  ;;  %v707_v20 = vpack.c.bf16 %v683_v10, %v682_v8  ;;  %v463_v22 = vld [vmem:[#allocation2 + $0xf0] sm:$0xff]  ;;  %v563_v27 = vpack.c.bf16 %v540_v14, %v539_v13 }
  0x3f   : > { %587 = vrot.lane.b32.xlu0 %v551_v31, %s3757_s17  ;;  %v461_v18 = vld [vmem:[#allocation2 + $0xd8] sm:$0xff]  ;;  %v462_v19 = vld [vmem:[#allocation2 + $0xe0] sm:$0xff]  ;;  %v685_v26 = vld [vmem:[#allocation2 + $0x12a] sm:$0xff]  ;;  %v564_v31 = vpack.c.bf16 %v542_v17, %v541_v16  ;;  %1635 = vst.msk [vmem:[#allocation4 + $0x50] sm:$0x1] %vm1629_vm9, %v3756_v1 }
  0x40   : > { %732 = vrot.lane.b32.xlu1 %v696_v32, %s3758_s18  ;;  %v488_v21 = vpack.c.bf16 %v462_v19, %v461_v18  ;;  %v464_v23 = vld [vmem:[#allocation2 + $0xf8] sm:$0xff]  ;;  %v684_v25 = vld [vmem:[#allocation2 + $0x122] sm:$0xff]  ;;  %v466_v34 = vld [vmem:[#allocation2 + $0x110] sm:$0xff]  ;;  %1636 = vst.msk [vmem:[#allocation4 + $0x60] sm:$0x1] %vm1629_vm9, %v3756_v1 }
  0x41   : > { %v489_v24 = vpack.c.bf16 %v464_v23, %v463_v22  ;;  %v686_v28 = vld [vmem:[#allocation2 + $0x13a] sm:$0xff]  ;;  %v687_v30 = vld [vmem:[#allocation2 + $0x142] sm:$0xff]  ;;  %v708_v32 = vpack.c.bf16 %v685_v26, %v684_v25  ;;  %v543_v37 = vld [vmem:[#allocation2 + $0x151] sm:$0xff]  ;;  %1637 = vst.msk [vmem:[#allocation4 + $0x70] sm:$0x1] %vm1629_vm9, %v3756_v1 }
  0x42   : > { %506 = vst.msk [vmem:[#allocation3 + $0x48] sm:$0xff] %vm332_vm0, %v488_v21  ;;  %v465_v33 = vld [vmem:[#allocation2 + $0x108] sm:$0xff]  ;;  %v467_v35 = vld [vmem:[#allocation2 + $0x120] sm:$0xff]  ;;  %v709_v36 = vpack.c.bf16 %v687_v30, %v686_v28  ;;  %v688_v46 = vld [vmem:[#allocation2 + $0x152] sm:$0xff] }
  0x43   : > { %601 = vrot.lane.b32.xlu0 %v558_v38, %s3757_s17  ;;  %507 = vst.msk [vmem:[#allocation3 + $0x50] sm:$0xff] %vm332_vm0, %v489_v24  ;;  %v544_v38 = vld [vmem:[#allocation2 + $0x159] sm:$0xff]  ;;  %v490_v39 = vpack.c.bf16 %v466_v34, %v465_v33  ;;  %v468_v40 = vld [vmem:[#allocation2 + $0x128] sm:$0xff]  ;;  %v3708_v18 = vld [vmem:[%s4621_s1 + $0x10] sm:$0x1f]  }
  0x44   : > { %746 = vrot.lane.b32.xlu1 %v703_v42, %s3758_s18  ;;  %v545_v41 = vld [vmem:[#allocation2 + $0x169] sm:$0xff]  ;;  %v546_v42 = vld [vmem:[#allocation2 + $0x171] sm:$0xff]  ;;  %v491_v43 = vpack.c.bf16 %v468_v40, %v467_v35  ;;  %v565_v44 = vpack.c.bf16 %v544_v38, %v543_v37  ;;  %v689_v47 = vld [vmem:[#allocation2 + $0x15a] sm:$0xff]  ;;  %v1356_v23 = vand.u32 %v3708_v18, %v3999_v9  ;;  %1638 = vst.msk [vmem:[#allocation4 + $0x80] sm:$0x1] %vm1629_vm9, %v3756_v1 }
  0x45   : > { %508 = vst.msk [vmem:[#allocation3 + $0x58] sm:$0xff] %vm332_vm0, %v490_v39  ;;  %v566_v45 = vpack.c.bf16 %v546_v42, %v545_v41  ;;  %v690_v48 = vld [vmem:[#allocation2 + $0x16a] sm:$0xff]  ;;  %v691_v49 = vld [vmem:[#allocation2 + $0x172] sm:$0xff]  ;;  %v710_v50 = vpack.c.bf16 %v689_v47, %v688_v46  ;;  %v470_v52 = vld [vmem:[#allocation2 + $0x140] sm:$0xff] }
  0x46   : > { %509 = vst.msk [vmem:[#allocation3 + $0x60] sm:$0xff] %vm332_vm0, %v491_v43  ;;  %v469_v51 = vld [vmem:[#allocation2 + $0x138] sm:$0xff]  ;;  %v711_v54 = vpack.c.bf16 %v691_v49, %v690_v48  ;;  %v547_v55 = vld [vmem:[#allocation2 + $0x181] sm:$0xff]  ;;  %v693_v2 = vld [vmem:[#allocation2 + $0x18a] sm:$0xff] }
  0x47   : > { %603 = vrot.lane.b32.xlu0 %v559_v53, %s3757_s17  ;;  %v471_v53 = vld [vmem:[#allocation2 + $0x150] sm:$0xff]  ;;  %v549_v59 = vld [vmem:[#allocation2 + $0x199] sm:$0xff]  ;;  %v550_v60 = vld [vmem:[#allocation2 + $0x1a1] sm:$0xff]  ;;  %1639 = vst.msk [vmem:[#allocation4 + $0x90] sm:$0x1] %vm1629_vm9, %v3756_v1 }
  0x48   : > { %605 = vrot.lane.b32.xlu1 %v560_v56, %s3757_s17  ;;  %v548_v56 = vld [vmem:[#allocation2 + $0x189] sm:$0xff]  ;;  %v568_v63 = vpack.c.bf16 %v550_v60, %v549_v59  ;;  %v694_v3 = vld [vmem:[#allocation2 + $0x19a] sm:$0xff]  ;;  %1642 = vst.msk [vmem:[#allocation4 + $0x29] sm:$0x1] %vm1629_vm9, %v3756_v1  ;;  %1643 = vst.msk [vmem:[#allocation4 + $0x39] sm:$0x1] %vm1629_vm9, %v3756_v1 }
  0x49   : > { %v567_v62 = vpack.c.bf16 %v548_v56, %v547_v55  ;;  %v692_v0 = vld [vmem:[#allocation2 + $0x182] sm:$0xff]  ;;  %v477_v26 = vld [vmem:[#allocation2 + $0x198] sm:$0xff]  ;;  %1644 = vst.msk [vmem:[#allocation4 + $0x49] sm:$0x1] %vm1629_vm9, %v3756_v1  ;;  %1645 = vst.msk [vmem:[#allocation4 + $0x59] sm:$0x1] %vm1629_vm9, %v3756_v1 }
  0x4a   : > { %v695_v4 = vld [vmem:[#allocation2 + $0x1a2] sm:$0xff]  ;;  %v712_v5 = vpack.c.bf16 %v693_v2, %v692_v0  ;;  %1646 = vst.msk [vmem:[#allocation4 + $0x69] sm:$0x1] %vm1629_vm9, %v3756_v1  ;;  %1647 = vst.msk [vmem:[#allocation4 + $0x79] sm:$0x1] %vm1629_vm9, %v3756_v1 }
  0x4b   : > { %748 = vrot.lane.b32.xlu0 %v704_v57, %s3758_s18  ;;  %v492_v57 = vpack.c.bf16 %v470_v52, %v469_v51  ;;  %v473_v6 = vld [vmem:[#allocation2 + $0x168] sm:$0xff]  ;;  %v713_v8 = vpack.c.bf16 %v695_v4, %v694_v3  ;;  %1648 = vst.msk [vmem:[#allocation4 + $0x89] sm:$0x1] %vm1629_vm9, %v3756_v1 }
  0x4c   : > { %750 = vrot.lane.b32.xlu1 %v705_v58, %s3758_s18  ;;  %v472_v58 = vld [vmem:[#allocation2 + $0x158] sm:$0xff]  ;;  %v476_v16 = vld [vmem:[#allocation2 + $0x188] sm:$0xff]  ;;  %1625 = vst.msk [vmem:[#allocation4 + $0x8] sm:$0x3] %vm1624_vm10, %v3756_v1  ;;  %1628 = vst.msk [vmem:[#allocation4 + $0x98] sm:$0x3] %vm1624_vm10, %v3756_v1 }
  0x4d   : > { %v493_v61 = vpack.c.bf16 %v472_v58, %v471_v53  ;;  %510 = vst.msk [vmem:[#allocation3 + $0x68] sm:$0xff] %vm332_vm0, %v492_v57  ;;  %vm3048_vm10 = vcmask 57376  }
  0x4e   : > { %1640 = vst.msk [vmem:[#allocation4 + $0x9] sm:$0x1] %vm1629_vm9, %v3756_v1  ;;  %1649 = vst.msk [vmem:[#allocation4 + $0x99] sm:$0x1] %vm1629_vm9, %v3756_v1  ;;  %vm3039_vm9 = vcmask 24576  }
  0x4f   : > { %607 = vrot.lane.b32.xlu0 %v561_v7, %s3757_s17  ;;  %511 = vst.msk [vmem:[#allocation3 + $0x70] sm:$0xff] %vm332_vm0, %v493_v61  ;;  %v474_v7 = vld [vmem:[#allocation2 + $0x170] sm:$0xff] }
  0x50   : > { %609 = vrot.lane.b32.xlu1 %v562_v12, %s3757_s17  ;;  %v494_v10 = vpack.c.bf16 %v474_v7, %v473_v6  ;;  %2379 = vst.msk [vmem:[#allocation6 + $0x15] sm:$0x1] %vm2370_vm15, %v3756_v1  ;;  %2372 = vst.msk [vmem:[#allocation6 + $0x8] sm:$0x1] %vm2370_vm15, %v3756_v1 }
  0x51   : > { %2373 = vst.msk [vmem:[#allocation6 + $0x10] sm:$0x1] %vm2370_vm15, %v3756_v1  ;;  %2374 = vst.msk [vmem:[#allocation6 + $0x18] sm:$0x1] %vm2370_vm15, %v3756_v1 }
  0x52   : > { %512 = vst.msk [vmem:[#allocation3 + $0x78] sm:$0xff] %vm332_vm0, %v494_v10 }
  0x53   : > { %752 = vrot.lane.b32.xlu0 %v706_v15, %s3758_s18  ;;  %v475_v15 = vld [vmem:[#allocation2 + $0x180] sm:$0xff]  ;;  %2375 = vst.msk [vmem:[#allocation6 + $0x20] sm:$0x1] %vm2370_vm15, %v3756_v1  ;;  %2378 = vst.msk [vmem:[#allocation6 + $0xd] sm:$0x1] %vm2370_vm15, %v3756_v1 }
  0x54   : > { %754 = vrot.lane.b32.xlu1 %v707_v20, %s3758_s18  ;;  %v495_v19 = vpack.c.bf16 %v476_v16, %v475_v15  ;;  %2380 = vst.msk [vmem:[#allocation6 + $0x1d] sm:$0x1] %vm2370_vm15, %v3756_v1  ;;  %2381 = vst.msk [vmem:[#allocation6 + $0x25] sm:$0x1] %vm2370_vm15, %v3756_v1 }
  0x56   : > { %513 = vst.msk [vmem:[#allocation3 + $0x80] sm:$0xff] %vm332_vm0, %v495_v19 }
  0x57   : > { %611 = vrot.lane.b32.xlu0 %v563_v27, %s3757_s17  ;;  %v478_v27 = vld [vmem:[#allocation2 + $0x1a0] sm:$0xff] }
  0x58   : > { %613 = vrot.lane.b32.xlu1 %v564_v31, %s3757_s17  ;;  %v496_v28 = vpack.c.bf16 %v478_v27, %v477_v26 }
  0x5a   : > { %514 = vst.msk [vmem:[#allocation3 + $0x88] sm:$0xff] %vm332_vm0, %v496_v28  ;;  %vm2366_vm0 = vcmask 259072  }
  0x5b   : > { %756 = vrot.lane.b32.xlu0 %v708_v32, %s3758_s18  ;;  %2367 = vst.msk [vmem:[#allocation6] sm:$0x3f] %vm2366_vm0, %v3756_v1  ;;  %2369 = vst.msk [vmem:[#allocation6 + $0x28] sm:$0x3f] %vm2366_vm0, %v3756_v1 }
  0x5c   : > { %758 = vrot.lane.b32.xlu1 %v709_v36, %s3758_s18  ;;  %2371 = vst.msk [vmem:[#allocation6] sm:$0x1] %vm2370_vm15, %v3756_v1  ;;  %2377 = vst.msk [vmem:[#allocation6 + $0x5] sm:$0x1] %vm2370_vm15, %v3756_v1 }
  0x5d   : > { %2376 = vst.msk [vmem:[#allocation6 + $0x28] sm:$0x1] %vm2370_vm15, %v3756_v1  ;;  %2382 = vst.msk [vmem:[#allocation6 + $0x2d] sm:$0x1] %vm2370_vm15, %v3756_v1 }
  0x5f   : > { %615 = vrot.lane.b32.xlu0 %v565_v44, %s3757_s17 }
  0x60   : > { %617 = vrot.lane.b32.xlu1 %v566_v45, %s3757_s17 }
  0x63   : > { %760 = vrot.lane.b32.xlu0 %v710_v50, %s3758_s18 }
  0x64   : > { %762 = vrot.lane.b32.xlu1 %v711_v54, %s3758_s18 }
  0x67   : > { %619 = vrot.lane.b32.xlu0 %v567_v62, %s3757_s17 }
  0x68   : > { %621 = vrot.lane.b32.xlu1 %v568_v63, %s3757_s17 }
  0x6b   : > { %764 = vrot.lane.b32.xlu0 %v712_v5, %s3758_s18 }
  0x6c   : > { %766 = vrot.lane.b32.xlu1 %v713_v8, %s3758_s18  ;;  %s3763_s18 = smov 64  }
  0x99   : > { %v590_v11 = vpop.permute.xlu0 %589 }
  0x9a   : > { %643 = vst.msk [vmem:[#allocation3 + $0x8] sm:$0xff] %vm641_vm5, %v590_v11  ;;  %v735_v12 = vpop.permute.xlu1 %734 }
  0x9b   : > { %788 = vst.msk [vmem:[#allocation3 + $0x8] sm:$0xff] %vm786_vm6, %v735_v12 }
  0x9d   : > { %v592_v13 = vpop.permute.xlu0 %591 }
  0x9e   : > { %644 = vst.msk [vmem:[#allocation3 + $0x10] sm:$0xff] %vm641_vm5, %v592_v13  ;;  %v737_v14 = vpop.permute.xlu1 %736 }
  0x9f   : > { %789 = vst.msk [vmem:[#allocation3 + $0x10] sm:$0xff] %vm786_vm6, %v737_v14 }
  0xa1   : > { %v594_v17 = vpop.permute.xlu0 %593 }
  0xa2   : > { %645 = vst.msk [vmem:[#allocation3 + $0x18] sm:$0xff] %vm641_vm5, %v594_v17  ;;  %v596_v20 = vpop.permute.xlu1 %595  ;;  %v824_v21 = vld [vmem:[#allocation3 + $0x8] sm:$0xff] }
  0xa3   : > { %646 = vst.msk [vmem:[#allocation3 + $0x20] sm:$0xff] %vm641_vm5, %v596_v20  ;;  %3410 = vmatprep.mubr.msk.bf16.mxu0 %vm848_vm7, %v824_v21 }
  0xa5   : > { %v739_v22 = vpop.permute.xlu0 %738 }
  0xa6   : > { %790 = vst.msk [vmem:[#allocation3 + $0x18] sm:$0xff] %vm786_vm6, %v739_v22  ;;  %v741_v24 = vpop.permute.xlu1 %740  ;;  %v4073_v25 = vld [vmem:[#allocation3 + $0x10] sm:$0xff] }
  0xa7   : > { %791 = vst.msk [vmem:[#allocation3 + $0x20] sm:$0xff] %vm786_vm6, %v741_v24  ;;  %3411 = vmatmul.mubr.msk.bf16.vlgmr.msra.gmra.mrb[0].mxu0 %vm848_vm7, %v4073_v25 }
  0xa8   : > { %3443 = vmatpush3.bf16.msra.mxu0 %v4014_v29 }
  0xa9   : > { %v598_v30 = vpop.permute.xlu0 %597  ;;  %3476 = vmatprep.subr.bf16.mxu0 %v1356_v23 }
  0xaa   : > { %647 = vst.msk [vmem:[#allocation3 + $0x28] sm:$0xff] %vm641_vm5, %v598_v30  ;;  %v600_v9 = vpop.permute.xlu1 %599 }
  0xab   : > { %648 = vst.msk [vmem:[#allocation3 + $0x30] sm:$0xff] %vm641_vm5, %v600_v9  ;;  %v4275_v9 = vld [vmem:[%s4622_s2] ss:$0 sm:$0xff] }
  0xad   : > { %v743_v31 = vpop.permute.xlu0 %742  ;;  %v4082_v32 = vld [vmem:[#allocation3 + $0x18] sm:$0xff] }
  0xae   : > { %792 = vst.msk [vmem:[#allocation3 + $0x28] sm:$0xff] %vm786_vm6, %v743_v31  ;;  %v745_v33 = vpop.permute.xlu1 %744  ;;  %3414 = vmatprep.mubr.msk.bf16.mxu0 %vm848_vm7, %v4082_v32  ;;  %v4087_v29 = vld [vmem:[#allocation3 + $0x20] sm:$0xff] }
  0xaf   : > { %793 = vst.msk [vmem:[#allocation3 + $0x30] sm:$0xff] %vm786_vm6, %v745_v33  ;;  %3415 = vmatmul.mubr.msk.bf16.gmra.mrb[4].mxu0 %vm848_vm7, %v4087_v29 }
  0xb1   : > { %v588_v34 = vpop.permute.xlu0 %587 }
  0xb2   : > { %642 = vst.msk [vmem:[#allocation3] sm:$0xff] %vm641_vm5, %v588_v34  ;;  %v733_v35 = vpop.permute.xlu1 %732 }
  0xb3   : > { %787 = vst.msk [vmem:[#allocation3] sm:$0xff] %vm786_vm6, %v733_v35 }
  0xb5   : > { %v4094_v36 = vld [vmem:[#allocation3 + $0x28] sm:$0xff]  ;;  %v602_v37 = vpop.permute.xlu0 %601 }
  0xb6   : > { %3418 = vmatprep.mubr.msk.bf16.mxu0 %vm848_vm7, %v4094_v36  ;;  %v4098_v38 = vld [vmem:[#allocation3 + $0x30] sm:$0xff]  ;;  %649 = vst.msk [vmem:[#allocation3 + $0x38] sm:$0xff] %vm641_vm5, %v602_v37  ;;  %v747_v39 = vpop.permute.xlu1 %746 }
  0xb7   : > { %3419 = vmatmul.mubr.msk.bf16.gmra.mrb[8].mxu0 %vm848_vm7, %v4098_v38  ;;  %794 = vst.msk [vmem:[#allocation3 + $0x38] sm:$0xff] %vm786_vm6, %v747_v39 }
  0xb9   : > { %v604_v40 = vpop.permute.xlu0 %603 }
  0xba   : > { %v805_v41 = vld [vmem:[#allocation3] sm:$0xff]  ;;  %650 = vst.msk [vmem:[#allocation3 + $0x40] sm:$0xff] %vm641_vm5, %v604_v40  ;;  %v606_v42 = vpop.permute.xlu1 %605 }
  0xbb   : > { %3444 = vmatprep.mubr.msk.bf16.mxu0 %vm848_vm7, %v805_v41  ;;  %651 = vst.msk [vmem:[#allocation3 + $0x48] sm:$0xff] %vm641_vm5, %v606_v42 }
  0xbd   : > { %v749_v43 = vpop.permute.xlu0 %748 }
  0xbe   : > { %795 = vst.msk [vmem:[#allocation3 + $0x40] sm:$0xff] %vm786_vm6, %v749_v43  ;;  %v751_v44 = vpop.permute.xlu1 %750  ;;  %v4108_v45 = vld [vmem:[#allocation3 + $0x38] sm:$0xff] }
  0xbf   : > { %3445 = vmatmul.mubr.msk.bf16.vlgmr.msra.gmra.mrb[0].mxu0 %vm848_vm7, %v824_v21  ;;  %796 = vst.msk [vmem:[#allocation3 + $0x48] sm:$0xff] %vm786_vm6, %v751_v44  ;;  %3422 = vmatprep.mubr.msk.bf16.mxu1 %vm848_vm7, %v4108_v45 }
  0xc0   : > { %3477 = vmatpush3.bf16.msra.mxu0 %v1356_v23  ;;  %3448 = vmatprep.mubr.msk.bf16.mxu0 %vm848_vm7, %v4073_v25 }
  0xc1   : > { %v608_v46 = vpop.permute.xlu0 %607 }
  0xc2   : > { %652 = vst.msk [vmem:[#allocation3 + $0x50] sm:$0xff] %vm641_vm5, %v608_v46  ;;  %v610_v47 = vpop.permute.xlu1 %609 }
  0xc3   : > { %653 = vst.msk [vmem:[#allocation3 + $0x58] sm:$0xff] %vm641_vm5, %v610_v47 }
  0xc5   : > { %v753_v48 = vpop.permute.xlu0 %752  ;;  %v4118_v49 = vld [vmem:[#allocation3 + $0x40] sm:$0xff] }
  0xc6   : > { %797 = vst.msk [vmem:[#allocation3 + $0x50] sm:$0xff] %vm786_vm6, %v753_v48  ;;  %3423 = vmatmul.mubr.msk.bf16.vlgmr.msra.gmra.mrb[0].mxu1 %vm848_vm7, %v4118_v49  ;;  %v755_v50 = vpop.permute.xlu1 %754  ;;  %v832_v51 = vld [vmem:[#allocation3 + $0x48] sm:$0xff] }
  0xc7   : > { %3449 = vmatmul.mubr.msk.bf16.gmra.mrb[4].mxu0 %vm848_vm7, %v4082_v32  ;;  %798 = vst.msk [vmem:[#allocation3 + $0x58] sm:$0xff] %vm786_vm6, %v755_v50  ;;  %3426 = vmatprep.mubr.msk.bf16.mxu1 %vm848_vm7, %v832_v51 }
  0xc8   : > { %3452 = vmatprep.mubr.msk.bf16.mxu0 %vm848_vm7, %v4087_v29 }
  0xc9   : > { %v612_v52 = vpop.permute.xlu0 %611 }
  0xca   : > { %654 = vst.msk [vmem:[#allocation3 + $0x60] sm:$0xff] %vm641_vm5, %v612_v52  ;;  %v614_v53 = vpop.permute.xlu1 %613 }
  0xcb   : > { %655 = vst.msk [vmem:[#allocation3 + $0x68] sm:$0xff] %vm641_vm5, %v614_v53 }
  0xcd   : > { %v757_v54 = vpop.permute.xlu0 %756  ;;  %v833_v55 = vld [vmem:[#allocation3 + $0x50] sm:$0xff] }
  0xce   : > { %799 = vst.msk [vmem:[#allocation3 + $0x60] sm:$0xff] %vm786_vm6, %v757_v54  ;;  %3427 = vmatmul.mubr.msk.bf16.gmra.mrb[4].mxu1 %vm848_vm7, %v833_v55  ;;  %v759_v56 = vpop.permute.xlu1 %758  ;;  %v834_v57 = vld [vmem:[#allocation3 + $0x58] sm:$0xff] }
  0xcf   : > { %3453 = vmatmul.mubr.msk.bf16.gmra.mrb[8].mxu0 %vm848_vm7, %v4094_v36  ;;  %800 = vst.msk [vmem:[#allocation3 + $0x68] sm:$0xff] %vm786_vm6, %v759_v56  ;;  %3430 = vmatprep.mubr.msk.bf16.mxu1 %vm848_vm7, %v834_v57 }
  0xd0   : > { %3456 = vmatprep.mubr.msk.bf16.mxu0 %vm848_vm7, %v4098_v38 }
  0xd1   : > { %v616_v58 = vpop.permute.xlu0 %615 }
  0xd2   : > { %656 = vst.msk [vmem:[#allocation3 + $0x70] sm:$0xff] %vm641_vm5, %v616_v58  ;;  %v618_v59 = vpop.permute.xlu1 %617 }
  0xd3   : > { %657 = vst.msk [vmem:[#allocation3 + $0x78] sm:$0xff] %vm641_vm5, %v618_v59 }
  0xd5   : > { %v761_v60 = vpop.permute.xlu0 %760  ;;  %v835_v61 = vld [vmem:[#allocation3 + $0x60] sm:$0xff] }
  0xd6   : > { %801 = vst.msk [vmem:[#allocation3 + $0x70] sm:$0xff] %vm786_vm6, %v761_v60  ;;  %3431 = vmatmul.mubr.msk.bf16.gmra.mrb[8].mxu1 %vm848_vm7, %v835_v61  ;;  %v763_v62 = vpop.permute.xlu1 %762  ;;  %v836_v63 = vld [vmem:[#allocation3 + $0x68] sm:$0xff] }
  0xd7   : > { %3457 = vmatmul.mubr.msk.bf16.gmra.mrb[12].mxu0 %vm848_vm7, %v4108_v45  ;;  %802 = vst.msk [vmem:[#allocation3 + $0x78] sm:$0xff] %vm786_vm6, %v763_v62  ;;  %3434 = vmatprep.mubr.msk.bf16.mxu1 %vm848_vm7, %v836_v63 }
  0xd8   : > { %3460 = vmatprep.mubr.msk.bf16.mxu0 %vm848_vm7, %v4118_v49 }
  0xd9   : > { %v620_v0 = vpop.permute.xlu0 %619 }
  0xda   : > { %658 = vst.msk [vmem:[#allocation3 + $0x80] sm:$0xff] %vm641_vm5, %v620_v0  ;;  %v622_v2 = vpop.permute.xlu1 %621 }
  0xdb   : > { %659 = vst.msk [vmem:[#allocation3 + $0x88] sm:$0xff] %vm641_vm5, %v622_v2  ;;  %vm2514_vm5 = vcmask 517376  }
  0xdd   : > { %v837_v3 = vld [vmem:[#allocation3 + $0x70] sm:$0xff]  ;;  %v765_v4 = vpop.permute.xlu0 %764 }
  0xde   : > { %3435 = vmatmul.mubr.msk.bf16.gmra.mrb[12].mxu1 %vm848_vm7, %v837_v3  ;;  %v838_v5 = vld [vmem:[#allocation3 + $0x78] sm:$0xff]  ;;  %803 = vst.msk [vmem:[#allocation3 + $0x80] sm:$0xff] %vm786_vm6, %v765_v4  ;;  %v767_v6 = vpop.permute.xlu1 %766 }
  0xdf   : > { %3461 = vmatmul.mubr.msk.bf16.gmra.mrb[16].mxu0 %vm848_vm7, %v832_v51  ;;  %3438 = vmatprep.mubr.msk.bf16.mxu1 %vm848_vm7, %v838_v5  ;;  %804 = vst.msk [vmem:[#allocation3 + $0x88] sm:$0xff] %vm786_vm6, %v767_v6  ;;  %vm2599_vm6 = vcmask 779776  }
  0xe0   : > { %3464 = vmatprep.mubr.msk.bf16.mxu0 %vm848_vm7, %v833_v55 }
  0xe5   : > { %v839_v7 = vld [vmem:[#allocation3 + $0x80] sm:$0xff] }
  0xe6   : > { %3439 = vmatmul.mubr.msk.bf16.gmra.mrb[16].mxu1 %vm848_vm7, %v839_v7  ;;  %v1298_v8 = vld [vmem:[#allocation3 + $0x88] sm:$0xff] }
  0xe7   : > { %3465 = vmatmul.mubr.msk.bf16.gmra.mrb[20].mxu0 %vm848_vm7, %v834_v57 }
  0xe8   : > { %3468 = vmatprep.mubr.msk.bf16.mxu0 %vm848_vm7, %v835_v61 }
  0xef   : > { %3469 = vmatmul.mubr.msk.bf16.gmra.mrb[24].mxu0 %vm848_vm7, %v836_v63 }
  0xf0   : > { %3472 = vmatprep.mubr.msk.bf16.mxu0 %vm848_vm7, %v837_v3 }
  0xf7   : > { %3473 = vmatmul.mubr.msk.bf16.gmra.mrb[28].mxu0 %vm848_vm7, %v838_v5 }
  0xf8   : > { %3478 = vmatprep.mubr.msk.bf16.mxu0 %vm848_vm7, %v4073_v25 }
  0xff   : > { %3479 = vmatmul.mubr.msk.bf16.vlgmr.msra.gmra.mrb[0].mxu0 %vm848_vm7, %v4082_v32 }
 0x100   : > { %3482 = vmatprep.mubr.msk.bf16.mxu0 %vm848_vm7, %v4087_v29 }
 0x107   : > { %3483 = vmatmul.mubr.msk.bf16.gmra.mrb[4].mxu0 %vm848_vm7, %v4094_v36 }
 0x108   : > { %3486 = vmatprep.mubr.msk.bf16.mxu0 %vm848_vm7, %v4098_v38 }
 0x10f   : > { %3487 = vmatmul.mubr.msk.bf16.gmra.mrb[8].mxu0 %vm848_vm7, %v4108_v45 }
 0x110   : > { %3490 = vmatprep.mubr.msk.bf16.mxu0 %vm848_vm7, %v4118_v49 }
 0x117   : > { %3491 = vmatmul.mubr.msk.bf16.gmra.mrb[12].mxu0 %vm848_vm7, %v832_v51 }
 0x118   : > { %3494 = vmatprep.mubr.msk.bf16.mxu0 %vm848_vm7, %v833_v55 }
 0x11f   : > { %3495 = vmatmul.mubr.msk.bf16.gmra.mrb[16].mxu0 %vm848_vm7, %v834_v57 }
 0x120   : > { %3498 = vmatprep.mubr.msk.bf16.mxu0 %vm848_vm7, %v835_v61 }
 0x127   : > { %3499 = vmatmul.mubr.msk.bf16.gmra.mrb[20].mxu0 %vm848_vm7, %v836_v63 }
 0x128   : > { %3502 = vmatprep.mubr.msk.bf16.mxu0 %vm848_vm7, %v837_v3 }
 0x12f   : > { %3503 = vmatmul.mubr.msk.bf16.gmra.mrb[24].mxu0 %vm848_vm7, %v838_v5 }
 0x130   : > { %3506 = vmatprep.mubr.msk.bf16.mxu0 %vm848_vm7, %v839_v7 }
 0x137   : > { %3507 = vmatmul.mubr.msk.bf16.gmra.mrb[28].mxu0 %vm848_vm7, %v1298_v8  ;;  %vm2697_vm7 = vcmask 785408  }
 0x199   : > { %v4226_v10 = vpop.f32.mrb[0].mxu1 }
 0x19a   : > { %v4228_v11 = vpop.f32.mrb[1].mxu1 }
 0x19b   : > { %v4230_v12 = vpop.f32.mrb[2].mxu1 }
 0x19c   : > { %v4232_v13 = vpop.f32.mrb[3].mxu1 }
 0x1a1   : > { %v4234_v14 = vpop.f32.mrb[4].mxu1 }
 0x1a2   : > { %v4236_v15 = vpop.f32.mrb[5].mxu1 }
 0x1a3   : > { %v4238_v16 = vpop.f32.mrb[6].mxu1 }
 0x1a4   : > { %v4240_v17 = vpop.f32.mrb[7].mxu1 }
 0x1a9   : > { %v4244_v18 = vpop.f32.mrb[8].mxu1 }
 0x1aa   : > { %v4250_v19 = vpop.f32.mrb[9].mxu1 }
 0x1ab   : > { %v4252_v20 = vpop.f32.mrb[10].mxu1 }
 0x1ac   : > { %v4254_v21 = vpop.f32.mrb[11].mxu1 }
 0x1b1   : > { %v4256_v22 = vpop.f32.mrb[12].mxu1 }
 0x1b2   : > { %v4258_v23 = vpop.f32.mrb[13].mxu1 }
 0x1b3   : > { %v4260_v24 = vpop.f32.mrb[14].mxu1 }
 0x1b4   : > { %v4262_v25 = vpop.f32.mrb[15].mxu1 }
 0x1b9   : > { %v4264_v26 = vpop.f32.mrb[16].mxu1 }
 0x1ba   : > { %v4266_v27 = vpop.f32.mrb[17].mxu1 }
 0x1bb   : > { %v4268_v28 = vpop.f32.mrb[18].mxu1 }
 0x1bc   : > { %v4270_v30 = vpop.f32.mrb[19].mxu1 }
 0x1d2   : > { %v3480_v31 = vpop.f32.mrb[0].mxu0 }
 0x1d3   : > { %v1560_v32 = vadd.f32 %v3480_v31, %v4275_v9  ;;  %v1392_v33 = vpop.f32.mrb[1].mxu0 }
 0x1d4   : > { %v1558_v29 = vadd.f32 %v4275_v9, %v1392_v33  ;;  %v3481_v34 = vpop.f32.mrb[2].mxu0 }
 0x1d5   : > { %v1592_v35 = vmax.f32 %v1560_v32, 0.0  ;;  %v1561_v36 = vadd.f32 %v3481_v34, %v4275_v9  ;;  %v1395_v37 = vpop.f32.mrb[3].mxu0 }
 0x1d6   : > { %v1590_v38 = vmax.f32 %v1558_v29, 0.0  ;;  %v1559_v39 = vadd.f32 %v4275_v9, %v1395_v37 }
 0x1d7   : > { %v1593_v40 = vmax.f32 %v1561_v36, 0.0 }
 0x1d8   : > { %v1650_v41 = vmax.f32 %v1590_v38, %v1592_v35  ;;  %v1591_v42 = vmax.f32 %v1559_v39, 0.0 }
 0x1da   : > { %1666 = vst.msk [vmem:[#allocation8] sm:$0xff] %vm1622_vm8, %v1650_v41  ;;  %v1651_v43 = vmax.f32 %v1591_v42, %v1593_v40  ;;  %v3484_v44 = vpop.f32.mrb[4].mxu0 }
 0x1db   : > { %v1564_v45 = vadd.f32 %v3484_v44, %v4275_v9  ;;  %v1408_v46 = vpop.f32.mrb[5].mxu0 }
 0x1dc   : > { %1667 = vst.msk [vmem:[#allocation8 + $0x8] sm:$0xff] %vm1622_vm8, %v1651_v43  ;;  %v1562_v47 = vadd.f32 %v4275_v9, %v1408_v46  ;;  %v3485_v48 = vpop.f32.mrb[6].mxu0 }
 0x1dd   : > { %v1596_v49 = vmax.f32 %v1564_v45, 0.0  ;;  %v1565_v50 = vadd.f32 %v3485_v48, %v4275_v9  ;;  %v1411_v51 = vpop.f32.mrb[7].mxu0 }
 0x1de   : > { %v1594_v52 = vmax.f32 %v1562_v47, 0.0  ;;  %v1563_v53 = vadd.f32 %v4275_v9, %v1411_v51 }
 0x1df   : > { %v1597_v54 = vmax.f32 %v1565_v50, 0.0 }
 0x1e0   : > { %v1652_v55 = vmax.f32 %v1594_v52, %v1596_v49  ;;  %v1595_v56 = vmax.f32 %v1563_v53, 0.0 }
 0x1e2   : > { %1668 = vst.msk [vmem:[#allocation8 + $0x10] sm:$0xff] %vm1622_vm8, %v1652_v55  ;;  %v1653_v57 = vmax.f32 %v1595_v56, %v1597_v54  ;;  %v3488_v58 = vpop.f32.mrb[8].mxu0 }
 0x1e3   : > { %v1682_v59 = vld [vmem:[#allocation8] ss:$2 sm:$0xff]  ;;  %v1698_v60 = vld [vmem:[#allocation8 + $0x1] ss:$2 sm:$0xff]  ;;  %v1568_v61 = vadd.f32 %v3488_v58, %v4275_v9  ;;  %v1424_v62 = vpop.f32.mrb[9].mxu0 }
 0x1e4   : > { %v1713_v63 = vmax.f32 %v1682_v59, %v1698_v60  ;;  %1669 = vst.msk [vmem:[#allocation8 + $0x18] sm:$0xff] %vm1622_vm8, %v1653_v57  ;;  %v1566_v0 = vadd.f32 %v4275_v9, %v1424_v62  ;;  %v3489_v2 = vpop.f32.mrb[10].mxu0 }
 0x1e5   : > { %v1600_v3 = vmax.f32 %v1568_v61, 0.0  ;;  %v1569_v4 = vadd.f32 %v3489_v2, %v4275_v9  ;;  %v1427_v5 = vpop.f32.mrb[11].mxu0 }
 0x1e6   : > { %1722 = vst.msk [vmem:[#allocation4 + $0x11] sm:$0xff] %vm1622_vm8, %v1713_v63  ;;  %v1598_v6 = vmax.f32 %v1566_v0, 0.0  ;;  %v1567_v7 = vadd.f32 %v4275_v9, %v1427_v5 }
 0x1e7   : > { %v1601_v8 = vmax.f32 %v1569_v4, 0.0 }
 0x1e8   : > { %v1654_v31 = vmax.f32 %v1598_v6, %v1600_v3  ;;  %v1599_v32 = vmax.f32 %v1567_v7, 0.0 }
 0x1ea   : > { %1670 = vst.msk [vmem:[#allocation8 + $0x20] sm:$0xff] %vm1622_vm8, %v1654_v31  ;;  %v1655_v33 = vmax.f32 %v1599_v32, %v1601_v8  ;;  %v3492_v29 = vpop.f32.mrb[12].mxu0 }
 0x1eb   : > { %v1684_v34 = vld [vmem:[#allocation8 + $0x10] ss:$2 sm:$0xff]  ;;  %v1700_v35 = vld [vmem:[#allocation8 + $0x11] ss:$2 sm:$0xff]  ;;  %v3602_v36 = vadd.f32 %v3492_v29, %v4226_v10  ;;  %v1440_v37 = vpop.f32.mrb[13].mxu0 }
 0x1ec   : > { %v1714_v38 = vmax.f32 %v1684_v34, %v1700_v35  ;;  %1671 = vst.msk [vmem:[#allocation8 + $0x28] sm:$0xff] %vm1622_vm8, %v1655_v33  ;;  %v3603_v39 = vadd.f32 %v1440_v37, %v4228_v11  ;;  %v3493_v40 = vpop.f32.mrb[14].mxu0  ;;  %v3710_v29 = vld [vmem:[%s4623_s3 + $0x18] sm:$0xff]  }
 0x1ed   : > { %v1572_v41 = vadd.f32 %v3602_v36, %v4275_v9  ;;  %v3604_v42 = vadd.f32 %v3493_v40, %v4230_v12  ;;  %v1443_v43 = vpop.f32.mrb[15].mxu0  ;;  %v1762_v44 = vld [vmem:[#allocation4 + $0x11] sm:$0xff]  ;;  %3510 = vmatprep.subr.bf16.mxu1 %v3710_v29 }
 0x1ee   : > { %v1731_v45 = vld [vmem:[#allocation4 + $0x10] sm:$0xff]  ;;  %1723 = vst.msk [vmem:[#allocation4 + $0x21] sm:$0xff] %vm1622_vm8, %v1714_v38  ;;  %v1570_v46 = vadd.f32 %v3603_v39, %v4275_v9  ;;  %v3605_v10 = vadd.f32 %v1443_v43, %v4232_v13  ;;  %v3296_v47 = vpack.c.bf16 %v1762_v44, %v1762_v44  ;;  %3511 = vmatpush3.bf16.msra.mxu1 %v3710_v29 }
 0x1ef   : > { %v1604_v48 = vmax.f32 %v1572_v41, 0.0  ;;  %v1573_v49 = vadd.f32 %v3604_v42, %v4275_v9  ;;  %v1853_v11 = vld [vmem:[#allocation4 + $0x12] sm:$0xff]  ;;  %v1741_v50 = vpack.c.bf16 %v1731_v45, %v1731_v45 }
 0x1f0   : > { %v1602_v51 = vmax.f32 %v1570_v46, 0.0  ;;  %v1571_v52 = vadd.f32 %v3605_v10, %v4275_v9  ;;  %1813 = vrot.lane.b32.xlu0 %v3296_v47, %s3760_s27  ;;  %v3306_v13 = vpack.c.bf16 %v1853_v11, %v1853_v11 }
 0x1f1   : > { %v1605_v12 = vmax.f32 %v1573_v49, 0.0  ;;  %1752 = vst.msk [vmem:[#allocation5 + $0x4] sm:$0xf] %vm1750_vm11, %v1741_v50 }
 0x1f2   : > { %v1656_v53 = vmax.f32 %v1602_v51, %v1604_v48  ;;  %v1603_v54 = vmax.f32 %v1571_v52, 0.0  ;;  %v3496_v55 = vpop.f32.mrb[16].mxu0 }
 0x1f3   : > { %v1686_v56 = vld [vmem:[#allocation8 + $0x20] ss:$2 sm:$0xff]  ;;  %v1702_v57 = vld [vmem:[#allocation8 + $0x21] ss:$2 sm:$0xff]  ;;  %v3606_v58 = vadd.f32 %v3496_v55, %v4234_v14  ;;  %v1456_v59 = vpop.f32.mrb[17].mxu0 }
 0x1f4   : > { %v1715_v60 = vmax.f32 %v1686_v56, %v1702_v57  ;;  %1672 = vst.msk [vmem:[#allocation8 + $0x30] sm:$0xff] %vm1622_vm8, %v1656_v53  ;;  %v1657_v61 = vmax.f32 %v1603_v54, %v1605_v12  ;;  %v3607_v62 = vadd.f32 %v1456_v59, %v4236_v15  ;;  %1904 = vrot.lane.b32.xlu0 %v3306_v13, %s3761_s28  ;;  %v3497_v63 = vpop.f32.mrb[18].mxu0 }
 0x1f5   : > { %v1576_v0 = vadd.f32 %v3606_v58, %v4275_v9  ;;  %v3608_v2 = vadd.f32 %v3497_v63, %v4238_v16  ;;  %v1459_v3 = vpop.f32.mrb[19].mxu0  ;;  %v1763_v4 = vld [vmem:[#allocation4 + $0x21] sm:$0xff] }
 0x1f6   : > { %v1732_v5 = vld [vmem:[#allocation4 + $0x20] sm:$0xff]  ;;  %1724 = vst.msk [vmem:[#allocation4 + $0x31] sm:$0xff] %vm1622_vm8, %v1715_v60  ;;  %1673 = vst.msk [vmem:[#allocation8 + $0x38] sm:$0xff] %vm1622_vm8, %v1657_v61  ;;  %v1574_v14 = vadd.f32 %v3607_v62, %v4275_v9  ;;  %v3609_v6 = vadd.f32 %v1459_v3, %v4240_v17  ;;  %v3297_v15 = vpack.c.bf16 %v1763_v4, %v1763_v4 }
 0x1f7   : > { %v1608_v7 = vmax.f32 %v1576_v0, 0.0  ;;  %v1577_v8 = vadd.f32 %v3608_v2, %v4275_v9  ;;  %v1854_v31 = vld [vmem:[#allocation4 + $0x22] sm:$0xff]  ;;  %v1742_v32 = vpack.c.bf16 %v1732_v5, %v1732_v5 }
 0x1f8   : > { %v1606_v33 = vmax.f32 %v1574_v14, 0.0  ;;  %v1575_v16 = vadd.f32 %v3609_v6, %v4275_v9  ;;  %1815 = vrot.lane.b32.xlu1 %v3297_v15, %s3760_s27  ;;  %v3307_v37 = vpack.c.bf16 %v1854_v31, %v1854_v31 }
 0x1f9   : > { %v1609_v34 = vmax.f32 %v1577_v8, 0.0  ;;  %1753 = vst.msk [vmem:[#allocation5 + $0x8] sm:$0xf] %vm1750_vm11, %v1742_v32 }
 0x1fa   : > { %v1658_v35 = vmax.f32 %v1606_v33, %v1608_v7  ;;  %v1607_v17 = vmax.f32 %v1575_v16, 0.0  ;;  %v3500_v36 = vpop.f32.mrb[20].mxu0 }
 0x1fb   : > { %v3610_v38 = vadd.f32 %v3500_v36, %v4244_v18  ;;  %v1472_v39 = vpop.f32.mrb[21].mxu0 }
 0x1fc   : > { %1674 = vst.msk [vmem:[#allocation8 + $0x40] sm:$0xff] %vm1622_vm8, %v1658_v35  ;;  %v1659_v40 = vmax.f32 %v1607_v17, %v1609_v34  ;;  %v3611_v41 = vadd.f32 %v1472_v39, %v4250_v19  ;;  %1906 = vrot.lane.b32.xlu1 %v3307_v37, %s3761_s28  ;;  %v3501_v42 = vpop.f32.mrb[22].mxu0 }
 0x1fd   : > { %v1688_v43 = vld [vmem:[#allocation8 + $0x30] ss:$2 sm:$0xff]  ;;  %v1704_v44 = vld [vmem:[#allocation8 + $0x31] ss:$2 sm:$0xff]  ;;  %v1580_v45 = vadd.f32 %v3610_v38, %v4275_v9  ;;  %v3612_v46 = vadd.f32 %v3501_v42, %v4252_v20  ;;  %v1475_v10 = vpop.f32.mrb[23].mxu0 }
 0x1fe   : > { %v1764_v47 = vld [vmem:[#allocation4 + $0x31] sm:$0xff]  ;;  %1675 = vst.msk [vmem:[#allocation8 + $0x48] sm:$0xff] %vm1622_vm8, %v1659_v40  ;;  %v1578_v18 = vadd.f32 %v3611_v41, %v4275_v9  ;;  %v3613_v48 = vadd.f32 %v1475_v10, %v4254_v21  ;;  %v1716_v11 = vmax.f32 %v1688_v43, %v1704_v44  ;;  %v3711_v21 = vld [vmem:[%s4623_s3 + $0x20] sm:$0xff]  }
 0x1ff   : > { %v3298_v49 = vpack.c.bf16 %v1764_v47, %v1764_v47  ;;  %v1733_v19 = vld [vmem:[#allocation4 + $0x30] sm:$0xff]  ;;  %v1612_v50 = vmax.f32 %v1580_v45, 0.0  ;;  %v1581_v51 = vadd.f32 %v3612_v46, %v4275_v9  ;;  %3512 = vmatprep.subr.bf16.mxu1 %v3711_v21 }
 0x200   : > { %v1855_v52 = vld [vmem:[#allocation4 + $0x32] sm:$0xff]  ;;  %v1743_v12 = vpack.c.bf16 %v1733_v19, %v1733_v19  ;;  %v1610_v53 = vmax.f32 %v1578_v18, 0.0  ;;  %v1579_v54 = vadd.f32 %v3613_v48, %v4275_v9  ;;  %1725 = vst.msk [vmem:[#allocation4 + $0x41] sm:$0xff] %vm1622_vm8, %v1716_v11  ;;  %3513 = vmatpush3.bf16.msra.mxu1 %v3711_v21 }
 0x201   : > { %1817 = vrot.lane.b32.xlu0 %v3298_v49, %s3760_s27  ;;  %v1613_v20 = vmax.f32 %v1581_v51, 0.0  ;;  %v3308_v57 = vpack.c.bf16 %v1855_v52, %v1855_v52 }
 0x202   : > { %1754 = vst.msk [vmem:[#allocation5 + $0xc] sm:$0xf] %vm1750_vm11, %v1743_v12  ;;  %v1660_v55 = vmax.f32 %v1610_v53, %v1612_v50  ;;  %v1611_v13 = vmax.f32 %v1579_v54, 0.0  ;;  %v3504_v56 = vpop.f32.mrb[24].mxu0 }
 0x203   : > { %v3614_v58 = vadd.f32 %v3504_v56, %v4256_v22  ;;  %v1488_v59 = vpop.f32.mrb[25].mxu0  ;;  %v3712_v22 = vld [vmem:[%s4623_s3 + $0x28] sm:$0xff]  }
 0x204   : > { %1676 = vst.msk [vmem:[#allocation8 + $0x50] sm:$0xff] %vm1622_vm8, %v1660_v55  ;;  %v1661_v60 = vmax.f32 %v1611_v13, %v1613_v20  ;;  %v3615_v61 = vadd.f32 %v1488_v59, %v4258_v23  ;;  %v3505_v62 = vpop.f32.mrb[26].mxu0  ;;  %3514 = vmatprep.subr.bf16.mxu1 %v3712_v22 }
 0x205   : > { %1908 = vrot.lane.b32.xlu0 %v3308_v57, %s3761_s28  ;;  %v1690_v63 = vld [vmem:[#allocation8 + $0x40] ss:$2 sm:$0xff]  ;;  %v1706_v0 = vld [vmem:[#allocation8 + $0x41] ss:$2 sm:$0xff]  ;;  %v1584_v2 = vadd.f32 %v3614_v58, %v4275_v9  ;;  %v3616_v3 = vadd.f32 %v3505_v62, %v4260_v24  ;;  %v1491_v4 = vpop.f32.mrb[27].mxu0  ;;  %3515 = vmatpush3.bf16.msra.mxu1 %v3712_v22 }
 0x206   : > { %1677 = vst.msk [vmem:[#allocation8 + $0x58] sm:$0xff] %vm1622_vm8, %v1661_v60  ;;  %v1582_v5 = vadd.f32 %v3615_v61, %v4275_v9  ;;  %v3617_v23 = vadd.f32 %v1491_v4, %v4262_v25  ;;  %v1717_v14 = vmax.f32 %v1690_v63, %v1706_v0  ;;  %v3715_v4 = vld [vmem:[%s4623_s3] sm:$0xff]  }
 0x207   : > { %v1616_v6 = vmax.f32 %v1584_v2, 0.0  ;;  %v1585_v15 = vadd.f32 %v3616_v3, %v4275_v9  ;;  %v1765_v7 = vld [vmem:[#allocation4 + $0x41] sm:$0xff]  ;;  %3524 = vmatprep.subr.bf16.mxu1 %v3715_v4 }
 0x208   : > { %v1734_v8 = vld [vmem:[#allocation4 + $0x40] sm:$0xff]  ;;  %v1614_v31 = vmax.f32 %v1582_v5, 0.0  ;;  %v1583_v24 = vadd.f32 %v3617_v23, %v4275_v9  ;;  %v3299_v32 = vpack.c.bf16 %v1765_v7, %v1765_v7  ;;  %1726 = vst.msk [vmem:[#allocation4 + $0x51] sm:$0xff] %vm1622_vm8, %v1717_v14 }
 0x209   : > { %v1617_v33 = vmax.f32 %v1585_v15, 0.0  ;;  %v1856_v16 = vld [vmem:[#allocation4 + $0x42] sm:$0xff]  ;;  %v1744_v29 = vpack.c.bf16 %v1734_v8, %v1734_v8 }
 0x20a   : > { %v1662_v34 = vmax.f32 %v1614_v31, %v1616_v6  ;;  %v1615_v35 = vmax.f32 %v1583_v24, 0.0  ;;  %1819 = vrot.lane.b32.xlu1 %v3299_v32, %s3760_s27  ;;  %v3508_v25 = vpop.f32.mrb[28].mxu0  ;;  %v3309_v40 = vpack.c.bf16 %v1856_v16, %v1856_v16  ;;  %v1730_v22 = vld [vmem:[#allocation4] sm:$0xff]  ;;  %v1739_v6 = vld [vmem:[#allocation4 + $0x90] sm:$0xff] }
 0x20b   : > { %v3618_v17 = vadd.f32 %v3508_v25, %v4264_v26  ;;  %v1504_v36 = vpop.f32.mrb[29].mxu0  ;;  %1755 = vst.msk [vmem:[#allocation5 + $0x10] sm:$0xf] %vm1750_vm11, %v1744_v29  ;;  %v1740_v5 = vpack.c.bf16 %v1730_v22, %v1730_v22  ;;  %v1761_v23 = vld [vmem:[#allocation4 + $0x1] sm:$0xff]  ;;  %v1749_v7 = vpack.c.bf16 %v1739_v6, %v1739_v6  ;;  %v1770_v31 = vld [vmem:[#allocation4 + $0x91] sm:$0xff] }
 0x20c   : > { %1678 = vst.msk [vmem:[#allocation8 + $0x60] sm:$0xff] %vm1622_vm8, %v1662_v34  ;;  %v1663_v37 = vmax.f32 %v1615_v35, %v1617_v33  ;;  %v3619_v38 = vadd.f32 %v1504_v36, %v4266_v27  ;;  %v3509_v39 = vpop.f32.mrb[30].mxu0  ;;  %v3295_v15 = vpack.c.bf16 %v1761_v23, %v1761_v23  ;;  %v3304_v29 = vpack.c.bf16 %v1770_v31, %v1770_v31  ;;  %v1852_v34 = vld [vmem:[#allocation4 + $0x2] sm:$0xff] }
 0x20d   : > { %v1692_v41 = vld [vmem:[#allocation8 + $0x50] ss:$2 sm:$0xff]  ;;  %v1708_v42 = vld [vmem:[#allocation8 + $0x51] ss:$2 sm:$0xff]  ;;  %v1588_v43 = vadd.f32 %v3618_v17, %v4275_v9  ;;  %v3620_v44 = vadd.f32 %v3509_v39, %v4268_v28  ;;  %v1507_v45 = vpop.f32.mrb[31].mxu0  ;;  %v3305_v25 = vpack.c.bf16 %v1852_v34, %v1852_v34 }
 0x20e   : > { %1679 = vst.msk [vmem:[#allocation8 + $0x68] sm:$0xff] %vm1622_vm8, %v1663_v37  ;;  %v1586_v26 = vadd.f32 %v3619_v38, %v4275_v9  ;;  %v3621_v46 = vadd.f32 %v1507_v45, %v4270_v30  ;;  %1910 = vrot.lane.b32.xlu1 %v3309_v40, %s3761_s28  ;;  %v1718_v10 = vmax.f32 %v1692_v41, %v1708_v42  ;;  %v1861_v17 = vld [vmem:[#allocation4 + $0x92] sm:$0xff] }
 0x20f   : > { %v1620_v47 = vmax.f32 %v1588_v43, 0.0  ;;  %v1589_v27 = vadd.f32 %v3620_v44, %v4275_v9  ;;  %v1766_v18 = vld [vmem:[#allocation4 + $0x51] sm:$0xff]  ;;  %1751 = vst.msk [vmem:[#allocation5] sm:$0xf] %vm1750_vm11, %v1740_v5  ;;  %1760 = vst.msk [vmem:[#allocation5 + $0x24] sm:$0xf] %vm1750_vm11, %v1749_v7  ;;  %v3314_v36 = vpack.c.bf16 %v1861_v17, %v1861_v17 }
 0x210   : > { %v1735_v48 = vld [vmem:[#allocation4 + $0x50] sm:$0xff]  ;;  %v1618_v49 = vmax.f32 %v1586_v26, 0.0  ;;  %v1587_v11 = vadd.f32 %v3621_v46, %v4275_v9  ;;  %v3300_v19 = vpack.c.bf16 %v1766_v18, %v1766_v18  ;;  %1727 = vst.msk [vmem:[#allocation4 + $0x61] sm:$0xff] %vm1622_vm8, %v1718_v10  ;;  %v3716_v46 = vld [vmem:[%s4623_s3 + $0x8] sm:$0xff]  }
 0x211   : > { %v1621_v28 = vmax.f32 %v1589_v27, 0.0  ;;  %v1857_v50 = vld [vmem:[#allocation4 + $0x52] sm:$0xff]  ;;  %v1745_v51 = vpack.c.bf16 %v1735_v48, %v1735_v48 }
 0x212   : > { %v1664_v52 = vmax.f32 %v1618_v49, %v1620_v47  ;;  %v1619_v12 = vmax.f32 %v1587_v11, 0.0  ;;  %1821 = vrot.lane.b32.xlu0 %v3300_v19, %s3760_s27  ;;  %v3310_v53 = vpack.c.bf16 %v1857_v50, %v1857_v50  ;;  %v3718_v18 = vld [vmem:[%s4623_s3 + $0x10] sm:$0xff]  }
 0x213   : > { %1756 = vst.msk [vmem:[#allocation5 + $0x14] sm:$0xf] %vm1750_vm11, %v1745_v51  ;;  %v3720_v49 = vld [vmem:[%s4623_s3 + $0x30] sm:$0xff]  }
 0x214   : > { %1680 = vst.msk [vmem:[#allocation8 + $0x70] sm:$0xff] %vm1622_vm8, %v1664_v52  ;;  %v1665_v30 = vmax.f32 %v1619_v12, %v1621_v28 }
 0x215   : > { %v1694_v54 = vld [vmem:[#allocation8 + $0x60] ss:$2 sm:$0xff]  ;;  %v1710_v20 = vld [vmem:[#allocation8 + $0x61] ss:$2 sm:$0xff] }
 0x216   : > { %1681 = vst.msk [vmem:[#allocation8 + $0x78] sm:$0xff] %vm1622_vm8, %v1665_v30  ;;  %1912 = vrot.lane.b32.xlu0 %v3310_v53, %s3761_s28  ;;  %v1719_v9 = vmax.f32 %v1694_v54, %v1710_v20 }
 0x217   : > { %v1767_v21 = vld [vmem:[#allocation4 + $0x61] sm:$0xff] }
 0x218   : > { %v1736_v55 = vld [vmem:[#allocation4 + $0x60] sm:$0xff]  ;;  %v3301_v13 = vpack.c.bf16 %v1767_v21, %v1767_v21  ;;  %1728 = vst.msk [vmem:[#allocation4 + $0x71] sm:$0xff] %vm1622_vm8, %v1719_v9  ;;  %v3723_v21 = vld [vmem:[%s4623_s3 + $0x38] sm:$0xff]  }
 0x219   : > { %v1746_v56 = vpack.c.bf16 %v1736_v55, %v1736_v55  ;;  %v1858_v57 = vld [vmem:[#allocation4 + $0x62] sm:$0xff] }
 0x21a   : > { %1823 = vrot.lane.b32.xlu1 %v3301_v13, %s3760_s27  ;;  %v3311_v58 = vpack.c.bf16 %v1858_v57, %v1858_v57  ;;  %v3726_v13 = vld [vmem:[%s4623_s3 + $0x40] sm:$0xff]  }
 0x21b   : > { %1757 = vst.msk [vmem:[#allocation5 + $0x18] sm:$0xf] %vm1750_vm11, %v1746_v56 }
 0x21d   : > { %v1696_v59 = vld [vmem:[#allocation8 + $0x70] ss:$2 sm:$0xff]  ;;  %v1712_v60 = vld [vmem:[#allocation8 + $0x71] ss:$2 sm:$0xff] }
 0x21e   : > { %1914 = vrot.lane.b32.xlu1 %v3311_v58, %s3761_s28  ;;  %v1720_v61 = vmax.f32 %v1696_v59, %v1712_v60 }
 0x21f   : > { %v1768_v62 = vld [vmem:[#allocation4 + $0x71] sm:$0xff] }
 0x220   : > { %v1737_v63 = vld [vmem:[#allocation4 + $0x70] sm:$0xff]  ;;  %v3302_v0 = vpack.c.bf16 %v1768_v62, %v1768_v62  ;;  %1729 = vst.msk [vmem:[#allocation4 + $0x81] sm:$0xff] %vm1622_vm8, %v1720_v61  ;;  %v3243_v61 = vld [vmem:[%s4624_s4] ss:$0 sm:$0xff]  ;;  %vm3004_vm8 = vcmask 60416  }
 0x221   : > { %v1747_v2 = vpack.c.bf16 %v1737_v63, %v1737_v63  ;;  %v1859_v3 = vld [vmem:[#allocation4 + $0x72] sm:$0xff] }
 0x222   : > { %1825 = vrot.lane.b32.xlu0 %v3302_v0, %s3760_s27  ;;  %v3312_v14 = vpack.c.bf16 %v1859_v3, %v1859_v3 }
 0x223   : > { %1758 = vst.msk [vmem:[#allocation5 + $0x1c] sm:$0xf] %vm1750_vm11, %v1747_v2 }
 0x226   : > { %1916 = vrot.lane.b32.xlu0 %v3312_v14, %s3761_s28 }
 0x227   : > { %v1769_v8 = vld [vmem:[#allocation4 + $0x81] sm:$0xff] }
 0x228   : > { %v1738_v24 = vld [vmem:[#allocation4 + $0x80] sm:$0xff]  ;;  %v3303_v32 = vpack.c.bf16 %v1769_v8, %v1769_v8 }
 0x229   : > { %v1748_v33 = vpack.c.bf16 %v1738_v24, %v1738_v24  ;;  %v1860_v16 = vld [vmem:[#allocation4 + $0x82] sm:$0xff] }
 0x22a   : > { %1827 = vrot.lane.b32.xlu1 %v3303_v32, %s3760_s27  ;;  %1811 = vrot.lane.b32.xlu0 %v3295_v15, %s3760_s27  ;;  %v3313_v35 = vpack.c.bf16 %v1860_v16, %v1860_v16 }
 0x22b   : > { %1759 = vst.msk [vmem:[#allocation5 + $0x20] sm:$0xf] %vm1750_vm11, %v1748_v33  ;;  %vm3057_vm11 = vcmask 90176  }
 0x22e   : > { %1918 = vrot.lane.b32.xlu1 %v3313_v35, %s3761_s28  ;;  %1829 = vrot.lane.b32.xlu0 %v3304_v29, %s3760_s27 }
 0x232   : > { %1902 = vrot.lane.b32.xlu1 %v3305_v25, %s3761_s28 }
 0x236   : > { %1920 = vrot.lane.b32.xlu1 %v3314_v36, %s3761_s28 }
 0x262   : > { %v1814_v37 = vpop.permute.xlu0 %1813 }
 0x263   : > { %1843 = vst.msk [vmem:[#allocation5 + $0x4] sm:$0xf] %vm1841_vm12, %v1814_v37 }
 0x266   : > { %v1905_v38 = vpop.permute.xlu0 %1904 }
 0x267   : > { %1934 = vst.msk [vmem:[#allocation5 + $0x4] sm:$0xf] %vm1932_vm13, %v1905_v38 }
 0x26a   : > { %v1816_v39 = vpop.permute.xlu1 %1815 }
 0x26b   : > { %1844 = vst.msk [vmem:[#allocation5 + $0x8] sm:$0xf] %vm1841_vm12, %v1816_v39 }
 0x26e   : > { %v1907_v40 = vpop.permute.xlu1 %1906 }
 0x26f   : > { %1935 = vst.msk [vmem:[#allocation5 + $0x8] sm:$0xf] %vm1932_vm13, %v1907_v40 }
 0x273   : > { %v1818_v41 = vpop.permute.xlu0 %1817 }
 0x274   : > { %1845 = vst.msk [vmem:[#allocation5 + $0xc] sm:$0xf] %vm1841_vm12, %v1818_v41 }
 0x276   : > { %v3709_v43 = vld [vmem:[#allocation5 + $0x4] sm:$0xff]  }
 0x277   : > { %v1909_v42 = vpop.permute.xlu0 %1908  ;;  %3516 = vmatprep.mubr.msk.bf16.mxu1 %vm2011_vm14, %v3709_v43 }
 0x278   : > { %1936 = vst.msk [vmem:[#allocation5 + $0xc] sm:$0xf] %vm1932_vm13, %v1909_v42 }
 0x27c   : > { %v1820_v44 = vpop.permute.xlu1 %1819 }
 0x27d   : > { %1846 = vst.msk [vmem:[#allocation5 + $0x10] sm:$0xf] %vm1841_vm12, %v1820_v44 }
 0x27f   : > { %v3721_v9 = vld [vmem:[#allocation5 + $0x8] sm:$0xff]  }
 0x280   : > { %v1911_v45 = vpop.permute.xlu1 %1910  ;;  %v3725_v57 = vld [vmem:[#allocation5 + $0x8] sm:$0xff]  }
 0x281   : > { %1937 = vst.msk [vmem:[#allocation5 + $0x10] sm:$0xf] %vm1932_vm13, %v1911_v45  ;;  %v3762_v45 = vmov 1983009808  }
 0x284   : > { %v1822_v26 = vpop.permute.xlu0 %1821 }
 0x285   : > { %1847 = vst.msk [vmem:[#allocation5 + $0x14] sm:$0xf] %vm1841_vm12, %v1822_v26  ;;  %v2455_v26 = vunpack.c.l.s4 %v3762_v45 }
 0x288   : > { %v1913_v10 = vpop.permute.xlu0 %1912  ;;  %v3713_v47 = vld [vmem:[#allocation5 + $0xc] sm:$0xff]  }
 0x289   : > { %1938 = vst.msk [vmem:[#allocation5 + $0x14] sm:$0xf] %vm1932_vm13, %v1913_v10  ;;  %3517 = vmatmul.mubr.msk.bf16.vlgmr.msra.gmra.mrb[20].mxu1 %vm2011_vm14, %v3713_v47  ;;  %v3730_v47 = vld [vmem:[%s4625_s5 + $0x30] sm:$0xff]  }
 0x28a   : > { %3525 = vmatpush3.bf16.msra.mxu1 %v3715_v4 }
 0x28b   : > { %3526 = vmatprep.subr.bf16.mxu1 %v3716_v46 }
 0x28c   : > { %v1824_v27 = vpop.permute.xlu1 %1823 }
 0x28d   : > { %1848 = vst.msk [vmem:[#allocation5 + $0x18] sm:$0xf] %vm1841_vm12, %v1824_v27  ;;  %v2456_v27 = vunpack.c.0.s8 %v2455_v26 }
 0x28e   : > { %3527 = vmatpush3.bf16.msra.mxu1 %v3716_v46  ;;  %v2457_v46 = vlaneseq }
 0x28f   : > { %3528 = vmatprep.subr.bf16.mxu1 %v3718_v18 }
 0x290   : > { %v1915_v48 = vpop.permute.xlu1 %1914  ;;  %v3722_v55 = vld [vmem:[#allocation5 + $0x10] sm:$0xff]  }
 0x291   : > { %1939 = vst.msk [vmem:[#allocation5 + $0x18] sm:$0xf] %vm1932_vm13, %v1915_v48  ;;  %v3727_v58 = vld [vmem:[#allocation5 + $0x10] sm:$0xff]   ;;  %v3731_v48 = vld [vmem:[%s4625_s5 + $0x38] sm:$0xff]  }
 0x292   : > { %3529 = vmatpush3.bf16.msra.mxu1 %v3718_v18  ;;  %v4470_v18 = vshrl.u32 %v2457_v46, 7 }
 0x293   : > { %3538 = vmatprep.subr.bf16.mxu1 %v3720_v49 }
 0x294   : > { %v1826_v11 = vpop.permute.xlu0 %1825 }
 0x295   : > { %1849 = vst.msk [vmem:[#allocation5 + $0x1c] sm:$0xf] %vm1841_vm12, %v1826_v11 }
 0x298   : > { %v1917_v19 = vpop.permute.xlu0 %1916  ;;  %v3714_v28 = vld [vmem:[#allocation5 + $0x14] sm:$0xff]  }
 0x299   : > { %1940 = vst.msk [vmem:[#allocation5 + $0x1c] sm:$0xf] %vm1932_vm13, %v1917_v19  ;;  %3520 = vmatprep.mubr.msk.bf16.mxu1 %vm2011_vm14, %v3714_v28 }
 0x29c   : > { %v1828_v50 = vpop.permute.xlu1 %1827  ;;  %v1812_v51 = vpop.permute.xlu0 %1811 }
 0x29d   : > { %1850 = vst.msk [vmem:[#allocation5 + $0x20] sm:$0xf] %vm1841_vm12, %v1828_v50  ;;  %1842 = vst.msk [vmem:[#allocation5] sm:$0xf] %vm1841_vm12, %v1812_v51  ;;  %v4477_v51 = vsub.s32 %v2456_v27, %v4470_v18 }
 0x2a0   : > { %v1919_v52 = vpop.permute.xlu1 %1918  ;;  %v1830_v12 = vpop.permute.xlu0 %1829  ;;  %v3724_v56 = vld [vmem:[#allocation5 + $0x18] sm:$0xff]  }
 0x2a1   : > { %1941 = vst.msk [vmem:[#allocation5 + $0x20] sm:$0xf] %vm1932_vm13, %v1919_v52  ;;  %v3728_v59 = vld [vmem:[#allocation5 + $0x18] sm:$0xff]  }
 0x2a2   : > { %1851 = vst.msk [vmem:[#allocation5 + $0x24] sm:$0xf] %vm1841_vm12, %v1830_v12  ;;  %vm3066_vm12 = vcmask 122976  }
 0x2a4   : > { %v1903_v30 = vpop.permute.xlu1 %1902 }
 0x2a5   : > { %1933 = vst.msk [vmem:[#allocation5] sm:$0xf] %vm1932_vm13, %v1903_v30 }
 0x2a8   : > { %v1921_v53 = vpop.permute.xlu1 %1920  ;;  %v3717_v54 = vld [vmem:[#allocation5 + $0x1c] sm:$0xff]  }
 0x2a9   : > { %1942 = vst.msk [vmem:[#allocation5 + $0x24] sm:$0xf] %vm1932_vm13, %v1921_v53  ;;  %3521 = vmatmul.mubr.msk.bf16.gmra.mrb[24].mxu1 %vm2011_vm14, %v3717_v54 }
 0x2ac   : > { %v3719_v20 = vld [vmem:[#allocation5] sm:$0xff]  }
 0x2ad   : > { %3530 = vmatprep.mubr.msk.bf16.mxu1 %vm2011_vm14, %v3719_v20 }
 0x2b0   : > { %v3729_v60 = vld [vmem:[#allocation5 + $0x20] sm:$0xff]  }
 0x2b1   : > { %3531 = vmatmul.mubr.msk.bf16.vlgmr.msra.gmra.mrb[20].mxu1 %vm2011_vm14, %v3721_v9 }
 0x2b2   : > { %3539 = vmatpush3.bf16.msra.mxu1 %v3720_v49  ;;  %3534 = vmatprep.mubr.msk.bf16.mxu1 %vm2011_vm14, %v3722_v55 }
 0x2b3   : > { %3540 = vmatprep.subr.bf16.mxu1 %v3723_v21 }
 0x2b6   : > { %3541 = vmatpush3.bf16.msra.mxu1 %v3723_v21 }
 0x2b7   : > { %3542 = vmatprep.subr.bf16.mxu1 %v3726_v13 }
 0x2b9   : > { %3535 = vmatmul.mubr.msk.bf16.gmra.mrb[24].mxu1 %vm2011_vm14, %v3724_v56 }
 0x2ba   : > { %3544 = vmatprep.mubr.msk.bf16.mxu1 %vm2011_vm14, %v3725_v57  ;;  %3543 = vmatpush3.bf16.msra.mxu1 %v3726_v13  ;;  %v3732_v57 = vld [vmem:[%s4625_s5 + $0x40] sm:$0xff]  }
 0x2bb   : > { %3552 = vmatprep.subr.bf16.mxu1 %v3756_v1 }
 0x2c1   : > { %3545 = vmatmul.mubr.msk.bf16.vlgmr.msra.gmra.mrb[20].mxu1 %vm2011_vm14, %v3727_v58 }
 0x2c2   : > { %3548 = vmatprep.mubr.msk.bf16.mxu1 %vm2011_vm14, %v3728_v59  ;;  %3553 = vmatpush3.bf16.msra.mxu1 %v3730_v47 }
 0x2c3   : > { %3554 = vmatprep.subr.bf16.mxu1 %v3756_v1 }
 0x2c6   : > { %3555 = vmatpush3.bf16.msra.mxu1 %v3731_v48 }
 0x2c7   : > { %3556 = vmatprep.subr.bf16.mxu1 %v3756_v1 }
 0x2c9   : > { %3549 = vmatmul.mubr.msk.bf16.gmra.mrb[24].mxu1 %vm2011_vm14, %v3729_v60 }
 0x2ca   : > { %3557 = vmatpush3.bf16.msra.mxu1 %v3732_v57  ;;  %3564 = vmatprep.mubr.msk.bf16.mxu1 %vm3764_vm4, %v3756_v1 }
 0x2cb   : > { %3558 = vmatprep.subr.bf16.mxu1 %v3756_v1 }
 0x394   : > { %v3546_v62 = vpop.f32.mrb[20].mxu1 }
 0x395   : > { %v2352_v63 = vadd.f32 %v3546_v62, %v3243_v61  ;;  %v2304_v0 = vpop.f32.mrb[21].mxu1  ;;  %v3733_v62 = vld [vmem:[%s4625_s5 + $0x48] sm:$0xff]  }
 0x396   : > { %v2350_v2 = vadd.f32 %v3243_v61, %v2304_v0  ;;  %v3547_v3 = vpop.f32.mrb[22].mxu1  ;;  %3559 = vmatpush3.bf16.msra.mxu1 %v3733_v62  ;;  %v3738_v62 = vld [vmem:[%s4625_s5 + $0x10] sm:$0xff]  }
 0x397   : > { %v2353_v4 = vadd.f32 %v3547_v3, %v3243_v61  ;;  %v2307_v22 = vpop.f32.mrb[23].mxu1  ;;  %v2360_v23 = vmax.f32 %v2352_v63, 0.0  ;;  %v2417_v63 = vld [vmem:[#allocation6] sm:$0xf]  ;;  %3560 = vmatprep.subr.bf16.mxu1 %v3756_v1 }
 0x398   : > { %v2351_v5 = vadd.f32 %v3243_v61, %v2307_v22  ;;  %v2358_v6 = vmax.f32 %v2350_v2, 0.0  ;;  %v2423_v0 = vpack.c.bf16 %v2417_v63, %v2417_v63  ;;  %v3739_v63 = vld [vmem:[%s4625_s5 + $0x18] sm:$0xff]  }
 0x399   : > { %v2361_v14 = vmax.f32 %v2353_v4, 0.0 }
 0x39a   : > { %v2359_v15 = vmax.f32 %v2351_v5, 0.0  ;;  %2430 = vst.msk [vmem:[#allocation7] sm:$0x3] %vm2429_vm3, %v2423_v0 }
 0x39b   : > { %v2384_v7 = vmax.f32 %v2360_v23, %v2361_v14 }
 0x39c   : > { %v2383_v8 = vmax.f32 %v2358_v6, %v2359_v15  ;;  %v3550_v31 = vpop.f32.mrb[24].mxu1 }
 0x39d   : > { %2389 = vst.msk [vmem:[#allocation9 + $0x8] sm:$0xff] %vm2387_vm1, %v2384_v7  ;;  %v2356_v24 = vadd.f32 %v3550_v31, %v3243_v61  ;;  %v2320_v32 = vpop.f32.mrb[25].mxu1  ;;  %v2521_v31 = vld [vmem:[#allocation6 + $0x2] sm:$0xf] }
 0x39e   : > { %2388 = vst.msk [vmem:[#allocation9] sm:$0xff] %vm2387_vm1, %v2383_v8  ;;  %v2354_v33 = vadd.f32 %v3243_v61, %v2320_v32  ;;  %v3551_v16 = vpop.f32.mrb[26].mxu1  ;;  %v3734_v32 = vld [vmem:[%s4625_s5 + $0x50] sm:$0xff]  }
 0x39f   : > { %v2357_v29 = vadd.f32 %v3551_v16, %v3243_v61  ;;  %v2323_v34 = vpop.f32.mrb[27].mxu1  ;;  %v2364_v25 = vmax.f32 %v2356_v24, 0.0  ;;  %3561 = vmatpush3.bf16.msra.mxu1 %v3734_v32  ;;  %v3745_v32 = vld [vmem:[%s4625_s5 + $0x78] sm:$0xff]  }
 0x3a0   : > { %v2355_v35 = vadd.f32 %v3243_v61, %v2323_v34  ;;  %v2362_v36 = vmax.f32 %v2354_v33, 0.0  ;;  %v2422_v33 = vld [vmem:[#allocation6 + $0x28] sm:$0xf]  ;;  %v2436_v34 = vld [vmem:[#allocation6 + $0x1] sm:$0xf]  ;;  %3562 = vmatprep.subr.bf16.mxu1 %v3756_v1 }
 0x3a1   : > { %v2365_v17 = vmax.f32 %v2357_v29, 0.0 }
 0x3a2   : > { %v2363_v37 = vmax.f32 %v2355_v35, 0.0  ;;  %v2428_v35 = vpack.c.bf16 %v2422_v33, %v2422_v33 }
 0x3a3   : > { %v2386_v38 = vmax.f32 %v2364_v25, %v2365_v17 }
 0x3a4   : > { %v2394_v39 = vld [vmem:[#allocation9 + $0x8] ss:$2 sm:$0xf]  ;;  %v2402_v40 = vld [vmem:[#allocation9 + $0x9] ss:$2 sm:$0xf]  ;;  %v2385_v41 = vmax.f32 %v2362_v36, %v2363_v37  ;;  %v2527_v36 = vpack.c.bf16 %v2521_v31, %v2521_v31  ;;  %v2442_v37 = vpack.c.bf16 %v2436_v34, %v2436_v34 }
 0x3a5   : > { %v2408_v42 = vmax.f32 %v2394_v39, %v2402_v40  ;;  %v2392_v43 = vld [vmem:[#allocation9] ss:$2 sm:$0xf]  ;;  %v2400_v44 = vld [vmem:[#allocation9 + $0x1] ss:$2 sm:$0xf] }
 0x3a6   : > { %2391 = vst.msk [vmem:[#allocation9 + $0x18] sm:$0xff] %vm2387_vm1, %v2386_v38  ;;  %v2407_v10 = vmax.f32 %v2392_v43, %v2400_v44  ;;  %2390 = vst.msk [vmem:[#allocation9 + $0x10] sm:$0xff] %vm2387_vm1, %v2385_v41  ;;  %v2526_v38 = vld [vmem:[#allocation6 + $0x2a] sm:$0xf]  ;;  %v3735_v39 = vld [vmem:[%s4625_s5 + $0x58] sm:$0xff]   ;;  %v2545_v43 = vrot.slane %v2527_v36, %v4477_v51  ;;  %v2460_v45 = vrot.slane %v2442_v37, %v4477_v51 }
 0x3a7   : > { %2414 = vst.msk [vmem:[#allocation6 + $0x11] sm:$0xf] %vm2412_vm2, %v2408_v42  ;;  %v2441_v41 = vld [vmem:[#allocation6 + $0x29] sm:$0xf]  ;;  %3563 = vmatpush3.bf16.msra.mxu1 %v3735_v39  ;;  %v2532_v44 = vpack.c.bf16 %v2526_v38, %v2526_v38  ;;  %v3743_v31 = vld [vmem:[%s4625_s5 + $0x68] sm:$0xff]  }
 0x3a8   : > { %2413 = vst.msk [vmem:[#allocation6 + $0x9] sm:$0xf] %vm2412_vm2, %v2407_v10  ;;  %3568 = vmatprep.subr.bf16.mxu1 %v3756_v1  ;;  %v2447_v26 = vpack.c.bf16 %v2441_v41, %v2441_v41  ;;  %v3747_v36 = vld [vmem:[%s4625_s5 + $0x88] sm:$0xff]  }
 0x3a9   : > { %2435 = vst.msk [vmem:[#allocation7 + $0xa] sm:$0x3] %vm2429_vm3, %v2428_v35  ;;  %v2580_v10 = vrot.slane %v2532_v44, %v4477_v51 }
 0x3aa   : > { %v2495_v47 = vrot.slane %v2447_v26, %v4477_v51 }
 0x3ad   : > { %v2398_v49 = vld [vmem:[#allocation9 + $0x18] ss:$2 sm:$0xf]  ;;  %v2406_v11 = vld [vmem:[#allocation9 + $0x19] ss:$2 sm:$0xf] }
 0x3ae   : > { %v2410_v19 = vmax.f32 %v2398_v49, %v2406_v11  ;;  %v2396_v28 = vld [vmem:[#allocation9 + $0x10] ss:$2 sm:$0xf]  ;;  %v2404_v50 = vld [vmem:[#allocation9 + $0x11] ss:$2 sm:$0xf] }
 0x3af   : > { %v2409_v52 = vmax.f32 %v2396_v28, %v2404_v50  ;;  %v2438_v12 = vld [vmem:[#allocation6 + $0x11] sm:$0xf]  ;;  %v2437_v20 = vld [vmem:[#allocation6 + $0x9] sm:$0xf] }
 0x3b0   : > { %v2523_v30 = vld [vmem:[#allocation6 + $0x12] sm:$0xf]  ;;  %v2444_v54 = vpack.c.bf16 %v2438_v12, %v2438_v12  ;;  %2416 = vst.msk [vmem:[#allocation6 + $0x21] sm:$0xf] %vm2412_vm2, %v2410_v19  ;;  %v2522_v9 = vld [vmem:[#allocation6 + $0xa] sm:$0xf]  ;;  %v2443_v13 = vpack.c.bf16 %v2437_v20, %v2437_v20 }
 0x3b1   : > { %v2419_v53 = vld [vmem:[#allocation6 + $0x10] sm:$0xf]  ;;  %v2418_v55 = vld [vmem:[#allocation6 + $0x8] sm:$0xf]  ;;  %2415 = vst.msk [vmem:[#allocation6 + $0x19] sm:$0xf] %vm2412_vm2, %v2409_v52  ;;  %v2529_v59 = vpack.c.bf16 %v2523_v30, %v2523_v30  ;;  %v2528_v61 = vpack.c.bf16 %v2522_v9, %v2522_v9 }
 0x3b2   : > { %v2425_v21 = vpack.c.bf16 %v2419_v53, %v2419_v53  ;;  %v2424_v56 = vpack.c.bf16 %v2418_v55, %v2418_v55  ;;  %v2474_v58 = vrot.slane %v2444_v54, %v4477_v51  ;;  %v2467_v60 = vrot.slane %v2443_v13, %v4477_v51 }
 0x3b3   : > { %v2559_v2 = vrot.slane %v2529_v59, %v4477_v51  ;;  %v2552_v3 = vrot.slane %v2528_v61, %v4477_v51  ;;  %v3736_v59 = vld [vmem:[%s4625_s5] sm:$0xff]   ;;  %v3737_v61 = vld [vmem:[%s4625_s5 + $0x8] sm:$0xff]  }
 0x3b4   : > { %2432 = vst.msk [vmem:[#allocation7 + $0x4] sm:$0x3] %vm2429_vm3, %v2425_v21  ;;  %2431 = vst.msk [vmem:[#allocation7 + $0x2] sm:$0x3] %vm2429_vm3, %v2424_v56  ;;  %2500 = vrot.lane.b32.xlu1 %v2474_v58, %s3761_s28  ;;  %2498 = vrot.lane.b32.xlu0 %v2467_v60, %s3761_s28 }
 0x3b7   : > { %v2440_v4 = vld [vmem:[#allocation6 + $0x21] sm:$0xf] }
 0x3b8   : > { %v2525_v22 = vld [vmem:[#allocation6 + $0x22] sm:$0xf]  ;;  %2585 = vrot.lane.b32.xlu1 %v2559_v2, %s3763_s18  ;;  %v2446_v23 = vpack.c.bf16 %v2440_v4, %v2440_v4  ;;  %v2439_v14 = vld [vmem:[#allocation6 + $0x19] sm:$0xf]  ;;  %2583 = vrot.lane.b32.xlu0 %v2552_v3, %s3763_s18 }
 0x3b9   : > { %v2421_v5 = vld [vmem:[#allocation6 + $0x20] sm:$0xf]  ;;  %v2524_v6 = vld [vmem:[#allocation6 + $0x1a] sm:$0xf]  ;;  %v2445_v8 = vpack.c.bf16 %v2439_v14, %v2439_v14  ;;  %v2531_v29 = vpack.c.bf16 %v2525_v22, %v2525_v22 }
 0x3ba   : > { %v2427_v15 = vpack.c.bf16 %v2421_v5, %v2421_v5  ;;  %v2420_v7 = vld [vmem:[#allocation6 + $0x18] sm:$0xf]  ;;  %v2488_v16 = vrot.slane %v2446_v23, %v4477_v51  ;;  %v2530_v17 = vpack.c.bf16 %v2524_v6, %v2524_v6  ;;  %v3741_v14 = vld [vmem:[%s4625_s5 + $0x28] sm:$0xff]  }
 0x3bb   : > { %v2426_v24 = vpack.c.bf16 %v2420_v7, %v2420_v7  ;;  %v2481_v25 = vrot.slane %v2445_v8, %v4477_v51  ;;  %v2573_v40 = vrot.slane %v2531_v29, %v4477_v51  ;;  %v3740_v2 = vld [vmem:[%s4625_s5 + $0x20] sm:$0xff]  }
 0x3bc   : > { %2434 = vst.msk [vmem:[#allocation7 + $0x8] sm:$0x3] %vm2429_vm3, %v2427_v15  ;;  %2504 = vrot.lane.b32.xlu1 %v2488_v16, %s3761_s28  ;;  %v2566_v42 = vrot.slane %v2530_v17, %v4477_v51  ;;  %v3742_v7 = vld [vmem:[%s4625_s5 + $0x60] sm:$0xff]  }
 0x3bd   : > { %2433 = vst.msk [vmem:[#allocation7 + $0x6] sm:$0x3] %vm2429_vm3, %v2426_v24  ;;  %2502 = vrot.lane.b32.xlu0 %v2481_v25, %s3761_s28  ;;  %v3744_v24 = vld [vmem:[%s4625_s5 + $0x70] sm:$0xff]   ;;  %v3746_v16 = vld [vmem:[%s4625_s5 + $0x80] sm:$0xff]  }
 0x3c0   : > { %2589 = vrot.lane.b32.xlu1 %v2573_v40, %s3763_s18  ;;  %v3765_v40 = vmov 0  }
 0x3c1   : > { %2587 = vrot.lane.b32.xlu0 %v2566_v42, %s3763_s18  ;;  %3704 = vset.pattern.permute.xlu1 %v3765_v40 }
 0x3c2   : > { %3705 = vset.pattern.permute.xlu0 %v3765_v40 }
 0x3c4   : > { %2581 = vrot.lane.b32.xlu1 %v2545_v43, %s3763_s18 }
 0x3c5   : > { %2496 = vrot.lane.b32.xlu0 %v2460_v45, %s3761_s28 }
 0x3c8   : > { %2591 = vrot.lane.b32.xlu1 %v2580_v10, %s3763_s18 }
 0x3c9   : > { %2506 = vrot.lane.b32.xlu0 %v2495_v47, %s3761_s28 }
 0x426   : > { %v2501_v27 = vpop.permute.xlu1 %2500  ;;  %v2499_v48 = vpop.permute.xlu0 %2498 }
 0x427   : > { %2517 = vst.msk [vmem:[#allocation7 + $0x4] sm:$0x3] %vm2514_vm5, %v2501_v27  ;;  %2516 = vst.msk [vmem:[#allocation7 + $0x2] sm:$0x3] %vm2514_vm5, %v2499_v48 }
 0x42a   : > { %v2586_v49 = vpop.permute.xlu1 %2585  ;;  %v2584_v11 = vpop.permute.xlu0 %2583 }
 0x42b   : > { %2602 = vst.msk [vmem:[#allocation7 + $0x4] sm:$0x3] %vm2599_vm6, %v2586_v49  ;;  %2601 = vst.msk [vmem:[#allocation7 + $0x2] sm:$0x3] %vm2599_vm6, %v2584_v11 }
 0x42e   : > { %v2505_v19 = vpop.permute.xlu1 %2504 }
 0x42f   : > { %2519 = vst.msk [vmem:[#allocation7 + $0x8] sm:$0x3] %vm2514_vm5, %v2505_v19  ;;  %v2503_v28 = vpop.permute.xlu0 %2502 }
 0x430   : > { %2518 = vst.msk [vmem:[#allocation7 + $0x6] sm:$0x3] %vm2514_vm5, %v2503_v28 }
 0x432   : > { %v2590_v50 = vpop.permute.xlu1 %2589  ;;  %v2623_v53 = vld [vmem:[#allocation7 + $0x2] sm:$0x3]  ;;  %v2624_v54 = vld [vmem:[#allocation7 + $0x4] sm:$0x3] }
 0x433   : > { %2604 = vst.msk [vmem:[#allocation7 + $0x8] sm:$0x3] %vm2599_vm6, %v2590_v50  ;;  %v2588_v52 = vpop.permute.xlu0 %2587  ;;  %v2644_v21 = vcombine.low %v2623_v53, %v2624_v54  ;;  %v2607_v3 = vld [vmem:[#allocation7 + $0x2] sm:$0x3]  ;;  %v2608_v5 = vld [vmem:[#allocation7 + $0x4] sm:$0x3] }
 0x434   : > { %2603 = vst.msk [vmem:[#allocation7 + $0x6] sm:$0x3] %vm2599_vm6, %v2588_v52  ;;  %v2850_v25 = vld [vmem:[#allocation7 + $0x4] sm:$0x3]  ;;  %v3290_v52 = vld [vmem:[%s4627_s7] ss:$0 sm:$0xff] }
 0x435   : > { %v2652_v57 = vrot.slane %v2644_v21, %v4477_v51 }
 0x436   : > { %v2582_v12 = vpop.permute.xlu1 %2581 }
 0x437   : > { %v2497_v30 = vpop.permute.xlu0 %2496 }
 0x438   : > { %2515 = vst.msk [vmem:[#allocation7] sm:$0x3] %vm2514_vm5, %v2497_v30 }
 0x439   : > { %2600 = vst.msk [vmem:[#allocation7] sm:$0x3] %vm2599_vm6, %v2582_v12 }
 0x43a   : > { %v2592_v20 = vpop.permute.xlu1 %2591  ;;  %v2626_v9 = vld [vmem:[#allocation7 + $0x8] sm:$0x3] }
 0x43b   : > { %v2507_v55 = vpop.permute.xlu0 %2506  ;;  %v2625_v13 = vld [vmem:[#allocation7 + $0x6] sm:$0x3]  ;;  %v2852_v34 = vld [vmem:[#allocation7 + $0x8] sm:$0x3] }
 0x43c   : > { %2520 = vst.msk [vmem:[#allocation7 + $0xa] sm:$0x3] %vm2514_vm5, %v2507_v55  ;;  %v2645_v56 = vcombine.low %v2625_v13, %v2626_v9  ;;  %v2609_v4 = vld [vmem:[#allocation7 + $0x6] sm:$0x3] }
 0x43d   : > { %2605 = vst.msk [vmem:[#allocation7 + $0xa] sm:$0x3] %vm2599_vm6, %v2592_v20  ;;  %v2747_v23 = vcombine.low %v2608_v5, %v2609_v4  ;;  %v2851_v29 = vld [vmem:[#allocation7 + $0x6] sm:$0x3] }
 0x43e   : > { %v2659_v58 = vrot.slane %v2645_v56, %v4477_v51  ;;  %v2871_v17 = vcombine.low %v2850_v25, %v2851_v29 }
 0x43f   : > { %v2761_v15 = vrot.slane %v2747_v23, %v4477_v51 }
 0x440   : > { %v2660_v60 = vcombine.low %v2652_v57, %v2659_v58  ;;  %v2606_v0 = vld [vmem:[#allocation7] sm:$0x3]  ;;  %v2879_v38 = vrot.slane %v2871_v17, %v4477_v51 }
 0x441   : > { %v2746_v22 = vcombine.low %v2606_v0, %v2607_v3  ;;  %v3033_v0 = vand.u32 127, %v2457_v46 }
 0x442   : > { %3565 = vmatmul.mubr.msk.bf16.vlgmr.msra.gmra.mrb[28].mxu1 %vm2697_vm7, %v2660_v60 }
 0x443   : > { %3569 = vmatpush3.bf16.msra.mxu1 %v3736_v59  ;;  %3580 = vmatprep.mubr.msk.bf16.mxu1 %vm3764_vm4, %v3756_v1  ;;  %v2754_v6 = vrot.slane %v2746_v22, %v4477_v51  ;;  %v3042_v3 = vadd.s32 4294967292, %v3033_v0  ;;  %v3051_v22 = vadd.s32 4294967288, %v3033_v0  ;;  %v3060_v5 = vadd.s32 4294967284, %v3033_v0 }
 0x444   : > { %3570 = vmatprep.subr.bf16.mxu1 %v3756_v1  ;;  %v2853_v33 = vld [vmem:[#allocation7 + $0xa] sm:$0x3] }
 0x445   : > { %v2762_v8 = vcombine.low %v2754_v6, %v2761_v15  ;;  %v2872_v35 = vcombine.low %v2852_v34, %v2853_v33  ;;  %v3045_v6 = vsub.s32 %v3042_v3, %v4470_v18  ;;  %v3054_v15 = vsub.s32 %v3051_v22, %v4470_v18 }
 0x447   : > { %3571 = vmatpush3.bf16.msra.mxu1 %v3737_v61  ;;  %v2886_v37 = vrot.slane %v2872_v35, %v4477_v51 }
 0x448   : > { %3572 = vmatprep.subr.bf16.mxu1 %v3756_v1 }
 0x449   : > { %v2887_v39 = vcombine.low %v2879_v38, %v2886_v37 }
 0x44b   : > { %3573 = vmatpush3.bf16.msra.mxu1 %v3738_v62 }
 0x44c   : > { %3574 = vmatprep.subr.bf16.mxu1 %v3756_v1 }
 0x44f   : > { %3575 = vmatpush3.bf16.msra.mxu1 %v3739_v63  ;;  %v3291_v63 = vld [vmem:[#allocation10] ss:$0 sm:$0xff] }
 0x450   : > { %3576 = vmatprep.subr.bf16.mxu1 %v3756_v1 }
 0x453   : > { %3577 = vmatpush3.bf16.msra.mxu1 %v3740_v2 }
 0x454   : > { %3578 = vmatprep.subr.bf16.mxu1 %v3756_v1 }
 0x457   : > { %3579 = vmatpush3.bf16.msra.mxu1 %v3741_v14  ;;  %v3036_v14 = vsub.s32 %v3033_v0, %v4470_v18 }
 0x458   : > { %3584 = vmatprep.subr.bf16.mxu1 %v3756_v1 }
 0x45a   : > { %3581 = vmatmul.mubr.msk.bf16.vlgmr.msra.gmra.mrb[28].mxu1 %vm2697_vm7, %v2762_v8 }
 0x45b   : > { %3585 = vmatpush3.bf16.msra.mxu1 %v3742_v7  ;;  %3596 = vmatprep.mubr.msk.bf16.mxu1 %vm3764_vm4, %v3756_v1 }
 0x45c   : > { %3586 = vmatprep.subr.bf16.mxu1 %v3756_v1 }
 0x45f   : > { %3587 = vmatpush3.bf16.msra.mxu1 %v3743_v31 }
 0x460   : > { %3588 = vmatprep.subr.bf16.mxu1 %v3756_v1 }
 0x463   : > { %3589 = vmatpush3.bf16.msra.mxu1 %v3744_v24 }
 0x464   : > { %3590 = vmatprep.subr.bf16.mxu1 %v3756_v1 }
 0x467   : > { %3591 = vmatpush3.bf16.msra.mxu1 %v3745_v32  ;;  %v3063_v32 = vsub.s32 %v3060_v5, %v4470_v18 }
 0x468   : > { %3592 = vmatprep.subr.bf16.mxu1 %v3756_v1 }
 0x46b   : > { %3593 = vmatpush3.bf16.msra.mxu1 %v3746_v16 }
 0x46c   : > { %3594 = vmatprep.subr.bf16.mxu1 %v3756_v1  ;;  %v3289_v1 = vld [vmem:[%s4626_s6] ss:$0 sm:$0xff] }
 0x46f   : > { %3595 = vmatpush3.bf16.msra.mxu1 %v3747_v36 }
 0x472   : > { %3597 = vmatmul.mubr.msk.bf16.vlgmr.msra.gmra.mrb[32].mxu1 %vm2697_vm7, %v2887_v39 }
 0x52d   : > { %v2836_v41 = vpop.f32.mrb[28].mxu1 }
 0x52e   : > { %v3582_v42 = vpop.f32.mrb[29].mxu1  ;;  %v2845_v26 = vcombine.high %v2836_v41, %v2836_v41 }
 0x52f   : > { %v2839_v43 = vpop.f32.mrb[30].mxu1 }
 0x530   : > { %v3583_v44 = vpop.f32.mrb[31].mxu1  ;;  %v2846_v27 = vcombine.high %v2839_v43, %v2839_v43 }
 0x545   : > { %v2961_v45 = vpop.f32.mrb[32].mxu1 }
 0x546   : > { %v2970_v10 = vcombine.high %v2961_v45, %v2961_v45  ;;  %v2974_v47 = vadd.f32 %v2961_v45, %v2836_v41  ;;  %v3598_v51 = vpop.f32.mrb[33].mxu1 }
 0x547   : > { %v2964_v48 = vpop.f32.mrb[34].mxu1 }
 0x548   : > { %v2975_v49 = vadd.f32 %v2970_v10, %v2845_v26  ;;  %v2985_v11 = vadd.f32 %v3289_v1, %v2974_v47  ;;  %v2971_v19 = vcombine.high %v2964_v48, %v2964_v48  ;;  %v2976_v28 = vadd.f32 %v2964_v48, %v2839_v43  ;;  %v3599_v50 = vpop.f32.mrb[35].mxu1 }
 0x54a   : > { %v2989_v12 = vmax.f32 %v2985_v11, 0.0  ;;  %v2977_v30 = vadd.f32 %v2971_v19, %v2846_v27  ;;  %v2987_v53 = vadd.f32 %v3289_v1, %v2976_v28  ;;  %v2986_v54 = vadd.f32 %v3289_v1, %v2975_v49 }
 0x54c   : > { %v2991_v20 = vmax.f32 %v2987_v53, 0.0  ;;  %v3000_v9 = vmul.f32 %v3290_v52, %v2989_v12  ;;  %v2990_v21 = vmax.f32 %v2986_v54, 0.0  ;;  %v2988_v55 = vadd.f32 %v3289_v1, %v2977_v30 }
 0x54e   : > { %v3005_v13 = vsel %vm3004_vm8, %v3000_v9, 0.0  ;;  %v3001_v56 = vmul.f32 %v3290_v52, %v2990_v21  ;;  %v3002_v57 = vmul.f32 %v3290_v52, %v2991_v20  ;;  %v2992_v58 = vmax.f32 %v2988_v55, 0.0 }
 0x54f   : > { %3006 = vadd.xlane.f32.xlu0 %v3005_v13 }
 0x550   : > { %v3008_v59 = vsel %vm3004_vm8, %v3001_v56, 0.0  ;;  %v3011_v60 = vsel %vm3004_vm8, %v3002_v57, 0.0  ;;  %v3003_v61 = vmul.f32 %v3290_v52, %v2992_v58 }
 0x551   : > { %3009 = vadd.xlane.f32.xlu1 %v3008_v59 }
 0x552   : > { %v3014_v62 = vsel %vm3004_vm8, %v3003_v61, 0.0 }
 0x553   : > { %3012 = vadd.xlane.f32.xlu0 %v3011_v60 }
 0x557   : > { %3015 = vadd.xlane.f32.xlu0 %v3014_v62 }
 0x562   : > { %3024 = vperm.xlu1 %3704, %v3291_v63  }
 0x5dc   : > { %v3007_v2 = vpop.xlane.xlu0 %3006 }
 0x5de   : > { %v3010_v4 = vpop.xlane.xlu1 %3009 }
 0x5e0   : > { %v3013_v23 = vpop.xlane.xlu0 %3012 }
 0x5e2   : > { %v3025_v7 = vpop.permute.xlu1 %3024 }
 0x5e3   : > { %v3027_v8 = vadd.f32 %v3025_v7, %v3007_v2  ;;  %v3028_v31 = vadd.f32 %v3025_v7, %v3010_v4  ;;  %v3029_v24 = vadd.f32 %v3025_v7, %v3013_v23 }
 0x5e4   : > { %v3016_v46 = vpop.xlane.xlu0 %3015 }
 0x5e5   : > { %v3037_v33 = vrot.slane %v3027_v8, %v3036_v14  ;;  %v3046_v16 = vrot.slane %v3028_v31, %v3045_v6  ;;  %v3030_v29 = vadd.f32 %v3025_v7, %v3016_v46  ;;  %v3055_v34 = vrot.slane %v3029_v24, %v3054_v15 }
 0x5e7   : > { %3040 = vst.msk [vmem:[%s330_s13] sm:$0x1] %vm3039_vm9, %v3037_v33  ;;  %v3064_v35 = vrot.slane %v3030_v29, %v3063_v32 }
 0x5e8   : > { %3049 = vst.msk [vmem:[%s330_s13] sm:$0x1] %vm3048_vm10, %v3046_v16 }
 0x5e9   : > { %3058 = vst.msk [vmem:[%s330_s13] sm:$0x1] %vm3057_vm11, %v3055_v34 }
 0x5ea   : > { %3067 = vst.msk [vmem:[%s330_s13] sm:$0x1] %vm3066_vm12, %v3064_v35 }
 0x5eb PF: > { %s21_s11 = sadd.s32 1, %s3754_s11  }
 0x5ec   : > { %p18_p4 = scmp.ge.s32.totalorder %s21_s11, 4  }
 0x5ee   :  { %20 = sbr.rel (!%p18_p4) target bundleno = 3 (0x3), region = 126 }

</bundles_post_ra>
